<compile_context>
chip_gen: v6e
topology: v6e:2x2x1
jax: 0.10.0
libtpu: 0.0.40
codegen_flags: <defaults>
</compile_context>

<pallas_src>
import math

import jax
import jax.numpy as jnp
from jax.experimental import pallas as pl
from jax.experimental.pallas import tpu as pltpu

BN_EPS = 1e-5


def _sigmoid(x):
    return 1.0 / (1.0 + jnp.exp(-x))


def _gate_fuse_conv1_kernel(f1_ref, f2_ref, wsse1_ref, wsse2_ref, w1_ref,
                            scale_ref, bias_ref, f3_ref):
    # f1_ref/f2_ref : (1, H, W, 128) NHWC input tiles (one batch element)
    # wsse*_ref     : (128, 128)  1x1 conv weights, (Cin, Cout) layout
    # w1_ref        : (256, 256)  1x1 conv weight for the concatenated features
    # scale/bias    : (1, 256)    folded BatchNorm affine
    # f3_ref        : (1, H, W, 256)
    H = f1_ref.shape[1]
    W = f1_ref.shape[2]
    C = f1_ref.shape[3]
    M = H * W

    x1 = f1_ref[...].reshape(M, C)
    x2 = f2_ref[...].reshape(M, C)

    g1 = _sigmoid(jnp.dot(x1, wsse1_ref[...], preferred_element_type=jnp.float32))
    g2 = _sigmoid(jnp.dot(x2, wsse2_ref[...], preferred_element_type=jnp.float32))
    y1 = x1 * g1
    y2 = x2 * g2

    # torch.cat((f11, f22), dim=1) folded into the 1x1 conv contraction (K = 256).
    ycat = jnp.concatenate([y1, y2], axis=-1)                             # (M, 2C)
    z = jnp.dot(ycat, w1_ref[...], preferred_element_type=jnp.float32)    # (M, 2C)

    f3 = jnp.maximum(z * scale_ref[...] + bias_ref[...], 0.0)             # BN + ReLU
    f3_ref[...] = f3.reshape(1, H, W, 2 * C).astype(f3_ref.dtype)


def _conv3x3_sigmoid_kernel(xpad_ref, w_ref, out_ref):
    # xpad_ref : (1, H+2, W+2, 256)  zero-padded NHWC f3 tile
    # w_ref    : (9*256, Cout_pad)   taps folded into the contraction dim, Cout lane-padded
    # out_ref  : (1, H, W, Cout_pad)
    H = out_ref.shape[1]
    W = out_ref.shape[2]
    Cin = xpad_ref.shape[3]
    Cout = out_ref.shape[3]
    M = H * W

    # im2col: one K = 9*Cin matmul instead of nine K=Cin dot + accumulate passes.
    cols = [xpad_ref[0, kh:kh + H, kw:kw + W, :].reshape(M, Cin)
            for kh in range(3) for kw in range(3)]
    patch = jnp.concatenate(cols, axis=-1)                                # (M, 9*Cin)

    acc = jnp.dot(patch, w_ref[...], preferred_element_type=jnp.float32)  # (M, Cout)
    out_ref[...] = _sigmoid(acc).reshape(1, H, W, Cout).astype(out_ref.dtype)


def _gate_fuse_conv1(f1, f2, wsse1, wsse2, w1, scale, bias):
    N, H, W, C = f1.shape
    C2 = 2 * C
    return pl.pallas_call(
        _gate_fuse_conv1_kernel,
        out_shape=jax.ShapeDtypeStruct((N, H, W, C2), jnp.float32),
        grid_spec=pltpu.PrefetchScalarGridSpec(
            num_scalar_prefetch=0,
            grid=(N,),
            in_specs=[
                pl.BlockSpec((1, H, W, C), lambda n: (n, 0, 0, 0)),
                pl.BlockSpec((1, H, W, C), lambda n: (n, 0, 0, 0)),
                pl.BlockSpec((C, C), lambda n: (0, 0)),
                pl.BlockSpec((C, C), lambda n: (0, 0)),
                pl.BlockSpec((C2, C2), lambda n: (0, 0)),
                pl.BlockSpec((1, C2), lambda n: (0, 0)),
                pl.BlockSpec((1, C2), lambda n: (0, 0)),
            ],
            out_specs=pl.BlockSpec((1, H, W, C2), lambda n: (n, 0, 0, 0)),
        ),
        compiler_params=pltpu.CompilerParams(
            dimension_semantics=("parallel",)),
    )(f1, f2, wsse1, wsse2, w1, scale, bias)


def _conv3x3_sigmoid(xpad, w2, cout_pad):
    N, Hp, Wp, Cin = xpad.shape
    H, W = Hp - 2, Wp - 2
    return pl.pallas_call(
        _conv3x3_sigmoid_kernel,
        out_shape=jax.ShapeDtypeStruct((N, H, W, cout_pad), jnp.float32),
        grid_spec=pltpu.PrefetchScalarGridSpec(
            num_scalar_prefetch=0,
            grid=(N,),
            in_specs=[
                pl.BlockSpec((1, Hp, Wp, Cin), lambda n: (n, 0, 0, 0)),
                pl.BlockSpec((9 * Cin, cout_pad), lambda n: (0, 0)),
            ],
            out_specs=pl.BlockSpec((1, H, W, cout_pad), lambda n: (n, 0, 0, 0)),
        ),
        compiler_params=pltpu.CompilerParams(
            dimension_semantics=("parallel",)),
    )(xpad, w2)


def make_params(key):
    """Deterministic synthetic parameters matching the PyTorch module's layer shapes."""
    ks = jax.random.split(key, 8)

    def conv_weight(k, cout, cin, ksz):
        fan_in = cin * ksz * ksz
        bound = 1.0 / math.sqrt(fan_in)
        return jax.random.uniform(k, (cout, cin, ksz, ksz), jnp.float32, -bound, bound)

    w_sse1 = conv_weight(ks[0], 128, 128, 1)    # sSE_1 : Conv2d(128,128,1x1, bias=False)
    w_sse11 = conv_weight(ks[1], 128, 128, 1)   # sSE_11: Conv2d(128,128,1x1, bias=False)
    w_c1 = conv_weight(ks[2], 256, 256, 1)      # conv1 : Conv2d(256,256,1x1, bias=False)
    w_c2 = conv_weight(ks[3], 2, 256, 3)        # conv2 : Conv2d(256,2,3x3,pad=1, bias=False)

    # BatchNorm2d(256) — inference-mode statistics folded into scale/bias.
    gamma = 1.0 + 0.1 * jax.random.normal(ks[4], (256,), jnp.float32)
    beta = 0.1 * jax.random.normal(ks[5], (256,), jnp.float32)
    mean = 0.1 * jax.random.normal(ks[6], (256,), jnp.float32)
    var = jnp.abs(1.0 + 0.1 * jax.random.normal(ks[7], (256,), jnp.float32))
    scale = gamma / jnp.sqrt(var + BN_EPS)
    bias = beta - mean * scale

    cout_pad = 128  # lane-dense output channels; only the first 2 are real

    # (Cout,Cin,1,1) -> (Cin,Cout) matmul layout
    wsse1_m = jnp.transpose(w_sse1[:, :, 0, 0], (1, 0))
    wsse11_m = jnp.transpose(w_sse11[:, :, 0, 0], (1, 0))
    w1_m = jnp.transpose(w_c1[:, :, 0, 0], (1, 0))
    # (Cout,Cin,3,3) -> (kh,kw,Cin,Cout) -> (9*Cin, Cout), then lane-pad Cout 2 -> 128
    w2_m = jnp.transpose(w_c2, (2, 3, 1, 0)).reshape(9 * 256, 2)
    w2_m = jnp.pad(w2_m, ((0, 0), (0, cout_pad - 2)))

    return dict(wsse1=wsse1_m, wsse11=wsse11_m, w1=w1_m,
                bn_scale=scale.reshape(1, 256), bn_bias=bias.reshape(1, 256),
                w2=w2_m, cout_pad=cout_pad)


def interactive_attention_3_forward(f1_nchw, f2_nchw, p):
    # NCHW -> NHWC (channels on the 128-lane axis)
    f1 = jnp.transpose(f1_nchw, (0, 2, 3, 1))
    f2 = jnp.transpose(f2_nchw, (0, 2, 3, 1))

    f3 = _gate_fuse_conv1(f1, f2, p["wsse1"], p["wsse11"], p["w1"],
                          p["bn_scale"], p["bn_bias"])
    f3p = jnp.pad(f3, ((0, 0), (1, 1), (1, 1), (0, 0)))   # padding=1 of conv2
    f4 = _conv3x3_sigmoid(f3p, p["w2"], p["cout_pad"])

    f4 = jnp.transpose(f4[..., :2], (0, 3, 1, 2))          # real channels, NHWC -> NCHW
    return f4[:, 0:1], f4[:, 1:2]                          # torch.split(f4, [1, 1], dim=1)


if __name__ == "__main__":
    key = jax.random.PRNGKey(0)
    k_params, k_f1, k_f2 = jax.random.split(key, 3)
    params = make_params(k_params)

    # Channel counts are fixed by the module (128 per input); small batch/spatial.
    N, C, H, W = 2, 128, 16, 16
    f1 = jax.random.normal(k_f1, (N, C, H, W), jnp.float32)
    f2 = jax.random.normal(k_f2, (N, C, H, W), jnp.float32)

    out1, out2 = interactive_attention_3_forward(f1, f2, params)
    out1, out2 = jax.block_until_ready((out1, out2))
    assert out1.shape == (N, 1, H, W), out1.shape
    assert out2.shape == (N, 1, H, W), out2.shape
    print("KERNEL_OK")
</pallas_src>

<mosaic_0001>
module attributes {stable_mosaic.version = 11 : i64} {
  func.func @_gate_fuse_conv1_kernel(%arg0: i32, %arg1: memref<1x16x16x128xf32, #tpu.memory_space<vmem>>, %arg2: memref<1x16x16x128xf32, #tpu.memory_space<vmem>>, %arg3: memref<128x128xf32, #tpu.memory_space<vmem>>, %arg4: memref<128x128xf32, #tpu.memory_space<vmem>>, %arg5: memref<256x256xf32, #tpu.memory_space<vmem>>, %arg6: memref<1x256xf32, #tpu.memory_space<vmem>>, %arg7: memref<1x256xf32, #tpu.memory_space<vmem>>, %arg8: memref<1x16x16x256xf32, #tpu.memory_space<vmem>>) attributes {dimension_semantics = [#tpu.dimension_semantics<parallel>], iteration_bounds = array<i64: 2>, scalar_prefetch = 0 : i64, scratch_operands = 0 : i64, tpu.core_type = #tpu.core_type<tc>, window_params = [{transform_indices = @transform_0, window_bounds = array<i64: 1, 16, 16, 128>}, {transform_indices = @transform_1, window_bounds = array<i64: 1, 16, 16, 128>}, {pipeline_mode = #tpu.pipeline_mode<synchronous>, transform_indices = @transform_2, window_bounds = array<i64: 128, 128>}, {pipeline_mode = #tpu.pipeline_mode<synchronous>, transform_indices = @transform_3, window_bounds = array<i64: 128, 128>}, {pipeline_mode = #tpu.pipeline_mode<synchronous>, transform_indices = @transform_4, window_bounds = array<i64: 256, 256>}, {pipeline_mode = #tpu.pipeline_mode<synchronous>, transform_indices = @transform_5, window_bounds = array<i64: 1, 256>}, {pipeline_mode = #tpu.pipeline_mode<synchronous>, transform_indices = @transform_6, window_bounds = array<i64: 1, 256>}, {transform_indices = @transform_7, window_bounds = array<i64: 1, 16, 16, 256>}]} {
    %c0 = arith.constant 0 : index
    %c0_0 = arith.constant 0 : index
    %c0_1 = arith.constant 0 : index
    %c0_2 = arith.constant 0 : index
    %0 = vector.load %arg1[%c0, %c0_0, %c0_1, %c0_2] : memref<1x16x16x128xf32, #tpu.memory_space<vmem>>, vector<1x16x16x128xf32>
    %1 = vector.shape_cast %0 : vector<1x16x16x128xf32> to vector<256x128xf32>
    %c0_3 = arith.constant 0 : index
    %c0_4 = arith.constant 0 : index
    %c0_5 = arith.constant 0 : index
    %c0_6 = arith.constant 0 : index
    %2 = vector.load %arg2[%c0_3, %c0_4, %c0_5, %c0_6] : memref<1x16x16x128xf32, #tpu.memory_space<vmem>>, vector<1x16x16x128xf32>
    %3 = vector.shape_cast %2 : vector<1x16x16x128xf32> to vector<256x128xf32>
    %c0_7 = arith.constant 0 : index
    %c0_8 = arith.constant 0 : index
    %4 = vector.load %arg3[%c0_7, %c0_8] : memref<128x128xf32, #tpu.memory_space<vmem>>, vector<128x128xf32>
    %cst = arith.constant dense<0.000000e+00> : vector<256x128xf32>
    %5 = tpu.matmul %1, %4, %cst {dimension_numbers = #tpu.dot_dimension_numbers<[1], [0], [0], [1], [0, 0, 1, 1], [], []>} : vector<256x128xf32>, vector<128x128xf32>, vector<256x128xf32> -> vector<256x128xf32>
    %cst_9 = arith.constant 0.000000e+00 : f32
    %6 = vector.broadcast %cst_9 : f32 to vector<256x128xf32>
    %7 = arith.subf %6, %5 : vector<256x128xf32>
    %8 = math.exp %7 : vector<256x128xf32>
    %cst_10 = arith.constant 1.000000e+00 : f32
    %9 = vector.broadcast %cst_10 : f32 to vector<256x128xf32>
    %10 = arith.addf %9, %8 : vector<256x128xf32>
    %cst_11 = arith.constant 1.000000e+00 : f32
    %11 = vector.broadcast %cst_11 : f32 to vector<256x128xf32>
    %12 = arith.divf %11, %10 : vector<256x128xf32>
    %c0_12 = arith.constant 0 : index
    %c0_13 = arith.constant 0 : index
    %13 = vector.load %arg4[%c0_12, %c0_13] : memref<128x128xf32, #tpu.memory_space<vmem>>, vector<128x128xf32>
    %cst_14 = arith.constant dense<0.000000e+00> : vector<256x128xf32>
    %14 = tpu.matmul %3, %13, %cst_14 {dimension_numbers = #tpu.dot_dimension_numbers<[1], [0], [0], [1], [0, 0, 1, 1], [], []>} : vector<256x128xf32>, vector<128x128xf32>, vector<256x128xf32> -> vector<256x128xf32>
    %cst_15 = arith.constant 0.000000e+00 : f32
    %15 = vector.broadcast %cst_15 : f32 to vector<256x128xf32>
    %16 = arith.subf %15, %14 : vector<256x128xf32>
    %17 = math.exp %16 : vector<256x128xf32>
    %cst_16 = arith.constant 1.000000e+00 : f32
    %18 = vector.broadcast %cst_16 : f32 to vector<256x128xf32>
    %19 = arith.addf %18, %17 : vector<256x128xf32>
    %cst_17 = arith.constant 1.000000e+00 : f32
    %20 = vector.broadcast %cst_17 : f32 to vector<256x128xf32>
    %21 = arith.divf %20, %19 : vector<256x128xf32>
    %22 = arith.mulf %1, %12 : vector<256x128xf32>
    %23 = arith.mulf %3, %21 : vector<256x128xf32>
    %24 = tpu.concatenate %22, %23 in 1 : vector<256x128xf32>, vector<256x128xf32> -> vector<256x256xf32>
    %c0_18 = arith.constant 0 : index
    %c0_19 = arith.constant 0 : index
    %25 = vector.load %arg5[%c0_18, %c0_19] : memref<256x256xf32, #tpu.memory_space<vmem>>, vector<256x256xf32>
    %cst_20 = arith.constant dense<0.000000e+00> : vector<256x256xf32>
    %26 = tpu.matmul %24, %25, %cst_20 {dimension_numbers = #tpu.dot_dimension_numbers<[1], [0], [0], [1], [0, 0, 1, 1], [], []>} : vector<256x256xf32>, vector<256x256xf32>, vector<256x256xf32> -> vector<256x256xf32>
    %c0_21 = arith.constant 0 : index
    %c0_22 = arith.constant 0 : index
    %27 = vector.load %arg6[%c0_21, %c0_22] : memref<1x256xf32, #tpu.memory_space<vmem>>, vector<1x256xf32>
    %28 = vector.broadcast %27 : vector<1x256xf32> to vector<256x256xf32>
    %29 = arith.mulf %26, %28 : vector<256x256xf32>
    %c0_23 = arith.constant 0 : index
    %c0_24 = arith.constant 0 : index
    %30 = vector.load %arg7[%c0_23, %c0_24] : memref<1x256xf32, #tpu.memory_space<vmem>>, vector<1x256xf32>
    %31 = vector.broadcast %30 : vector<1x256xf32> to vector<256x256xf32>
    %32 = arith.addf %29, %31 : vector<256x256xf32>
    %cst_25 = arith.constant 0.000000e+00 : f32
    %33 = vector.broadcast %cst_25 : f32 to vector<256x256xf32>
    %34 = arith.maximumf %32, %33 : vector<256x256xf32>
    %35 = vector.shape_cast %34 : vector<256x256xf32> to vector<1x16x16x256xf32>
    %c0_26 = arith.constant 0 : index
    %c0_27 = arith.constant 0 : index
    %c0_28 = arith.constant 0 : index
    %c0_29 = arith.constant 0 : index
    %36 = vector.load %arg8[%c0_26, %c0_27, %c0_28, %c0_29] : memref<1x16x16x256xf32, #tpu.memory_space<vmem>>, vector<1x16x16x256xf32>
    tpu.vector_store %arg8[%c0_26, %c0_27, %c0_28, %c0_29], %35 {strides = array<i32>} : memref<1x16x16x256xf32, #tpu.memory_space<vmem>>, vector<1x16x16x256xf32>,
    return
  }
  func.func @transform_0(%arg0: i32) -> (i32, i32, i32, i32) {
    %c0_i32 = arith.constant 0 : i32
    %c0_i32_0 = arith.constant 0 : i32
    %c0_i32_1 = arith.constant 0 : i32
    %c0_i32_2 = arith.constant 0 : i32
    return %arg0, %c0_i32, %c0_i32_0, %c0_i32_1 : i32, i32, i32, i32
  }
  func.func @transform_1(%arg0: i32) -> (i32, i32, i32, i32) {
    %c0_i32 = arith.constant 0 : i32
    %c0_i32_0 = arith.constant 0 : i32
    %c0_i32_1 = arith.constant 0 : i32
    %c0_i32_2 = arith.constant 0 : i32
    return %arg0, %c0_i32, %c0_i32_0, %c0_i32_1 : i32, i32, i32, i32
  }
  func.func @transform_2(%arg0: i32) -> (i32, i32) {
    %c0_i32 = arith.constant 0 : i32
    %c0_i32_0 = arith.constant 0 : i32
    %c0_i32_1 = arith.constant 0 : i32
    return %c0_i32, %c0_i32_0 : i32, i32
  }
  func.func @transform_3(%arg0: i32) -> (i32, i32) {
    %c0_i32 = arith.constant 0 : i32
    %c0_i32_0 = arith.constant 0 : i32
    %c0_i32_1 = arith.constant 0 : i32
    return %c0_i32, %c0_i32_0 : i32, i32
  }
  func.func @transform_4(%arg0: i32) -> (i32, i32) {
    %c0_i32 = arith.constant 0 : i32
    %c0_i32_0 = arith.constant 0 : i32
    %c0_i32_1 = arith.constant 0 : i32
    return %c0_i32, %c0_i32_0 : i32, i32
  }
  func.func @transform_5(%arg0: i32) -> (i32, i32) {
    %c0_i32 = arith.constant 0 : i32
    %c0_i32_0 = arith.constant 0 : i32
    %c0_i32_1 = arith.constant 0 : i32
    return %c0_i32, %c0_i32_0 : i32, i32
  }
  func.func @transform_6(%arg0: i32) -> (i32, i32) {
    %c0_i32 = arith.constant 0 : i32
    %c0_i32_0 = arith.constant 0 : i32
    %c0_i32_1 = arith.constant 0 : i32
    return %c0_i32, %c0_i32_0 : i32, i32
  }
  func.func @transform_7(%arg0: i32) -> (i32, i32, i32, i32) {
    %c0_i32 = arith.constant 0 : i32
    %c0_i32_0 = arith.constant 0 : i32
    %c0_i32_1 = arith.constant 0 : i32
    %c0_i32_2 = arith.constant 0 : i32
    return %arg0, %c0_i32, %c0_i32_0, %c0_i32_1 : i32, i32, i32, i32
  }
}

</mosaic_0001>

<bundles_post_ra>
// kernel: tpu_custom_call.1
= control target key start
LH: loop header
LB: loop body
LE: loop exit
PB: predicated region body
PF: predicated region fallthrough
CT: control target
= control target key end

     0   :  { %s3831_s0 = inlined_call_operand.hbm [shape: f32[2,16,16,128], index: 0, kind: input, shape index: {}]   ;;  %s3832_s1 = inlined_call_operand.hbm [shape: f32[2,16,16,128], index: 1, kind: input, shape index: {}]   ;;  %s3833_s2 = inlined_call_operand.hbm [shape: f32[128,128], index: 2, kind: input, shape index: {}]   ;;  %s3834_s3 = inlined_call_operand.hbm [shape: f32[128,128], index: 3, kind: input, shape index: {}]   ;;  %s3835_s4 = inlined_call_operand.hbm [shape: f32[256,256], index: 4, kind: input, shape index: {}]   ;;  %s3836_s5 = inlined_call_operand.vmem [shape: f32[1,256], index: 5, kind: input, shape index: {}]   ;;  %s3837_s6 = inlined_call_operand.vmem [shape: f32[1,256], index: 6, kind: input, shape index: {}]   ;;  %s3838_s7 = inlined_call_operand.hbm [shape: f32[2,16,16,256], index: 7, kind: output, shape index: {}]  }
   0x1   :  { %3847 = sst [smem:[#allocation19_spill]] %s3831_s0 }
   0x2   :  { %3848 = sst [smem:[#allocation20_spill]] %s3833_s2 }
   0x3   :  { %3849 = sst [smem:[#allocation21_spill]] %s3834_s3 }
   0x4   :  { %3850 = sst [smem:[#allocation22_spill]] %s3835_s4 }
   0x5   :  { %12 = vsyncpa [#allocation3], 0 }
   0x6   :  { %14 = vsyncpa [#allocation3 + $0x1], 0 }
   0x7   :  { %15 = vsyncpa [#allocation6], 0 }
   0x8   :  { %17 = vsyncpa [#allocation6 + $0x1], 0 }
   0x9   :  { %18 = vsyncpa [#allocation9], 0 }
   0xa   :  { %19 = vsyncpa [#allocation4], 0 }
   0xb   :  { %21 = vsyncpa [#allocation4 + $0x1], 0  ;;  %s3124_s24 = smov 0   ;;  %s3126_s25 = smov 0  }
   0xc   :  { %s3128_s26 = smov 0   ;;  %s3130_s27 = smov 0  }
   0xd LB: > { %3851 = sst [smem:[#allocation17_spill]] %s3066_s26  ;;  %s3145_s28 = sadd.s32 4294967295, %s3070_s27   ;;  %s3070_s27 = sphi %s3130_s27, %s3877_s27   ;;  %s3066_s26 = sphi %s3128_s26, %s3874_s26   ;;  %s3062_s25 = sphi %s3126_s25, %s3876_s25   ;;  %s3058_s24 = sphi %s3124_s24, %s3875_s24  }
   0xe   : > { %s2113_s29 = sadd.s32 4294967294, %s3070_s27   ;;  %p47_p0 = scmp.ne.s32.totalorder %s3062_s25, %s3058_s24 }
   0xf   : > { %p3839_p1 = scmp.eq.s32.totalorder %s3145_s28, 0  ;;  %p202_p2 = scmp.eq.s32.totalorder %s3145_s28, 1 }
  0x10   : > { %p208_p3 = scmp.eq.s32.totalorder %s2113_s29, 1  ;;  %p2114_p5 = scmp.ge.s32.totalorder %s3070_s27, 1 }
  0x11   : > { %p3154_p4 = por %p3839_p1, %p47_p0  ;;  %p215_p7 = scmp.lt.s32.totalorder %s3070_s27, 3 }
  0x12   : > { %p3159_p6 = por %p208_p3, %p47_p0  ;;  %s3072_s10 = smov [#allocation7]  }
  0x13   : > { %s3852_s30 = scalar_select %p3154_p4, 1, 0 }
  0x14   : > { %s3853_s8 = scalar_select %p3159_p6, 1, 0 }
  0x15   : > { %p3164_p8 = pnand %p2114_p5, %p215_p7  ;;  %s227_s11 = sshll.u32 %s3072_s10, 4  ;;  %s228_s11 = int_to_ptr.vmem [resolvable:$true] %s227_s11 }
  0x16   : > { %s3073_s13 = smov [#allocation8]   ;;  %s3074_s15 = smov [#allocation10]  }
  0x17   : > { %p2478_p9 = pneg %p3164_p8  ;;  %s240_s14 = sshll.u32 %s3073_s13, 4  ;;  %s241_s14 = int_to_ptr.vmem [resolvable:$true] %s240_s14 }
  0x18   : > { %s253_s16 = sshll.u32 %s3074_s15, 4  ;;  %s2871_s17 = scalar_lea.vmem %s228_s11, 2048  ;;  %s254_s16 = int_to_ptr.vmem [resolvable:$true] %s253_s16 }
  0x19   : > { %p3173_p11 = pnand %p2478_p9, %p3839_p1  ;;  %p2872_p13 = scmp.ne.s32.totalorder %s228_s11, %s2871_s17 }
  0x1a   : > { %p2879_p5 = scmp.lt.s32.totalorder %s228_s11, %s228_s11  ;;  %p2880_p7 = scmp.lt.s32.totalorder %s2871_s17, %s2871_s17 }
  0x1b   : > { %p2862_p12 = pneg %p3173_p11 }
  0x1c   : > { %p2881_p9 = por %p2880_p7, %p2879_p5 }
  0x1d   : > { %p2874_p0 = pnand %p2872_p13, %p2862_p12 }
  0x1f   : > { %p2875_p3 = pneg %p2874_p0 }
  0x21   : > { %p2882_p10 = pnand %p2881_p9, %p2875_p3 }
  0x23   : > { %2885 = shalt.err (!%p2882_p10)
}
  0x24   : > { %s3840_s18 = smov 128   ;;  %s3842_s19 = smov 8  }
  0x25   : > { %s3856_s2 = sld [smem:[#allocation20_spill]]  ;;  %s2897_s22 = scalar_lea.vmem %s241_s14, 2048 }
  0x26   : > { %p2898_p13 = scmp.ne.s32.totalorder %s241_s14, %s2897_s22  ;;  %p2905_p3 = scmp.lt.s32.totalorder %s241_s14, %s241_s14 }
  0x27   : > { %p2906_p10 = scmp.lt.s32.totalorder %s2897_s22, %s2897_s22 }
  0x28   : > { %p2900_p0 = pnand %p2898_p13, %p2862_p12 }
  0x29   : > { %p2907_p7 = por %p2906_p10, %p2905_p3 }
  0x2a   : > { %p2901_p5 = pneg %p2900_p0 }
  0x2b   : > { %2481 = dma.hbm_to_vmem [thread:$0]  (!%p3173_p11), %s3856_s2, 2048, %s228_s11, [#allocation6], %s3840_s18, %s3840_s18, %s3842_s19  }
  0x2c   : > { %p2908_p9 = pnand %p2907_p7, %p2901_p5 }
  0x2e   : > { %2911 = shalt.err (!%p2908_p9)
}
  0x2f   : > { %s3857_s3 = sld [smem:[#allocation21_spill]]  ;;  %s2923_s10 = scalar_lea.vmem %s254_s16, 8192 }
  0x30   : > { %p2924_p1 = scmp.ne.s32.totalorder %s254_s16, %s2923_s10  ;;  %p2931_p3 = scmp.lt.s32.totalorder %s254_s16, %s254_s16 }
  0x31   : > { %p2932_p5 = scmp.lt.s32.totalorder %s2923_s10, %s2923_s10 }
  0x32   : > { %p2926_p13 = pnand %p2924_p1, %p2862_p12 }
  0x33   : > { %p2933_p10 = por %p2932_p5, %p2931_p3 }
  0x34   : > { %p2927_p0 = pneg %p2926_p13 }
  0x35   : > { %2484 = dma.hbm_to_vmem [thread:$0]  (!%p3173_p11), %s3857_s3, 2048, %s241_s14, [#allocation9], %s3840_s18, %s3840_s18, %s3842_s19  }
  0x36   : > { %p2934_p7 = pnand %p2933_p10, %p2927_p0 }
  0x38   : > { %2937 = shalt.err (!%p2934_p7)
}
  0x39   : > { %s3077_s11 = smov 256   ;;  %s3078_s13 = smov 16  }
  0x3a   : > { %s3858_s4 = sld [smem:[#allocation22_spill]]  ;;  %s3210_s17 = sadd.s32 1, %s3070_s27  }
  0x3b   : > { %s31_s20 = ssub.s32 %s3070_s27, %s3210_s17  ;;  %s34_s21 = sadd.s32 1, %s3066_s26 }
  0x3c   : > { %p32_p1 = scmp.eq.s32.totalorder %s31_s20, 0  ;;  %p41_p12 = scmp.ne.s32.totalorder %s3066_s26, %s3062_s25 }
  0x3d   : > { %p42_p9 = scmp.eq.s32.totalorder %s3070_s27, 0  ;;  %p2502_p13 = scmp.lt.s32.totalorder %s3070_s27, 2 }
  0x3e   : > { %s3220_s22 = scalar_select %p32_p1, %s3066_s26, %s34_s21  }
  0x3f   : > { %p43_p0 = por %p42_p9, %p41_p12  ;;  %p3224_p3 = por %p202_p2, %p41_p12 }
  0x40   : > { %2487 = dma.hbm_to_vmem [thread:$0]  (!%p3173_p11), %s3858_s4, 8192, %s254_s16, [#allocation9], %s3077_s11, %s3077_s11, %s3078_s13  }
  0x41   : > { %3859 = sst [smem:[#allocation18_spill]] %s3220_s22  ;;  %s273_s12 = sand.u32 1, %s3066_s26  }
  0x42   : > { %s3860_s23 = scalar_select %p3224_p3, 1, 0 }
  0x43   : > { %s2137_s29 = sshll.u32 %s3070_s27, 12  ;;  %s3230_s16 = sshll.u32 %s273_s12, 8 }
  0x44   : > { %s3861_s0 = sld [smem:[#allocation19_spill]]  ;;  %s277_s14 = scalar_lea.vmem [#allocation2], %s3230_s16 }
  0x45   : > { %s284_s15 = sshll.u32 %s277_s14, 4  ;;  %p3238_p11 = pnand %p2502_p13, %p43_p0  ;;  %s3242_s15 = int_to_ptr.vmem [resolvable:$true] %s284_s15 }
  0x46   : > { %s3247_s10 = scalar_lea.hbm %s3832_s1, %s2137_s29  ;;  %s3249_s11 = scalar_lea.sflag [#allocation3], %s273_s12 }
  0x47   : > { %p2940_p5 = pneg %p3238_p11 }
  0x4a   : > { %s3235_s13 = scalar_lea.hbm %s3861_s0, %s2137_s29  ;;  %s2943_s3 = scalar_lea.hbm %s3861_s0, 8192 }
  0x4b   : > { %s2938_s19 = scalar_lea.hbm %s3235_s13, 4096  ;;  %p2944_p1 = scmp.lt.s32.totalorder %s3235_s13, %s3861_s0 }
  0x4c   : > { %p2939_p2 = scmp.ne.s32.totalorder %s3235_s13, %s2938_s19  ;;  %p2945_p12 = scmp.lt.s32.totalorder %s2943_s3, %s2938_s19 }
  0x4e   : > { %p2941_p10 = pnand %p2940_p5, %p2939_p2  ;;  %p2946_p9 = por %p2945_p12, %p2944_p1 }
  0x50   : > { %p2942_p7 = pneg %p2941_p10 }
  0x52   : > { %p2947_p13 = pnand %p2946_p9, %p2942_p7 }
  0x54   : > { %2950 = shalt.err (!%p2947_p13)
}
  0x55   : > { %s2951_s18 = scalar_lea.vmem %s3242_s15, 4096  ;;  %s3079_s2 = smov [#allocation2]  }
  0x56   : > { %p2952_p0 = scmp.ne.s32.totalorder %s3242_s15, %s2951_s18  ;;  %s2956_s12 = sshll.u32 %s3079_s2, 4  ;;  %s2957_s12 = int_to_ptr.vmem [resolvable:$false] %s2956_s12 }
  0x57   : > { %s2958_s29 = scalar_lea.vmem %s2957_s12, 8192  ;;  %p2959_p6 = scmp.lt.s32.totalorder %s3242_s15, %s2957_s12 }
  0x58   : > { %p2954_p2 = pnand %p2952_p0, %p2940_p5  ;;  %p2960_p3 = scmp.lt.s32.totalorder %s2958_s29, %s2951_s18 }
  0x5a   : > { %p2955_p10 = pneg %p2954_p2  ;;  %p2961_p4 = por %p2960_p3, %p2959_p6 }
  0x5c   : > { %p2962_p1 = pnand %p2961_p4, %p2955_p10 }
  0x5e   : > { %2965 = shalt.err (!%p2962_p1)
}
  0x5f   : > { %s3863_s3 = smov 8   ;;  %s3864_s4 = smov 128  }
  0x60   : > { %2491 = dma.hbm_to_vmem [thread:$0]  (!%p3238_p11), %s3235_s13, 4096, %s3242_s15, %s3249_s11, %s3864_s4, %s3864_s4, %s3863_s3  }
  0x61   : > { %s298_s19 = scalar_lea.vmem [#allocation5], %s3230_s16  ;;  %s294_s21 = sand.u32 1, %s3070_s27  }
  0x62   : > { %s305_s22 = sshll.u32 %s298_s19, 4  ;;  %s295_s14 = scalar_lea.sflag [#allocation6], %s294_s21  ;;  %s3281_s22 = int_to_ptr.vmem [resolvable:$true] %s305_s22 }
  0x63   : > { %s2966_s18 = scalar_lea.hbm %s3247_s10, 4096  ;;  %s2971_s29 = scalar_lea.hbm %s3832_s1, 8192 }
  0x64   : > { %p2967_p4 = scmp.ne.s32.totalorder %s3247_s10, %s2966_s18  ;;  %p2972_p7 = scmp.lt.s32.totalorder %s3247_s10, %s3832_s1 }
  0x65   : > { %p2973_p12 = scmp.lt.s32.totalorder %s2971_s29, %s2966_s18 }
  0x66   : > { %p2969_p6 = pnand %p2967_p4, %p2940_p5 }
  0x67   : > { %p2974_p9 = por %p2973_p12, %p2972_p7 }
  0x68   : > { %p2970_p3 = pneg %p2969_p6 }
  0x6a   : > { %p2975_p13 = pnand %p2974_p9, %p2970_p3 }
  0x6c   : > { %2978 = shalt.err (!%p2975_p13)
}
  0x6d   : > { %s2979_s16 = scalar_lea.vmem %s3281_s22, 4096  ;;  %s3080_s13 = smov [#allocation5]  }
  0x6e   : > { %p2980_p0 = scmp.ne.s32.totalorder %s3281_s22, %s2979_s16  ;;  %s2984_s15 = sshll.u32 %s3080_s13, 4  ;;  %s2985_s15 = int_to_ptr.vmem [resolvable:$false] %s2984_s15 }
  0x6f   : > { %s2986_s11 = scalar_lea.vmem %s2985_s15, 8192  ;;  %p2987_p1 = scmp.lt.s32.totalorder %s3281_s22, %s2985_s15 }
  0x70   : > { %p2982_p2 = pnand %p2980_p0, %p2940_p5  ;;  %p2988_p4 = scmp.lt.s32.totalorder %s2986_s11, %s2979_s16 }
  0x72   : > { %p2983_p10 = pneg %p2982_p2  ;;  %p2989_p6 = por %p2988_p4, %p2987_p1 }
  0x74   : > { %p2990_p7 = pnand %p2989_p6, %p2983_p10 }
  0x76   : > { %2993 = shalt.err (!%p2990_p7)
}
  0x77   : > { %2494 = dma.hbm_to_vmem [thread:$0]  (!%p3238_p11), %s3247_s10, 4096, %s3281_s22, %s295_s14, %s3864_s4, %s3864_s4, %s3863_s3  }
  0x78   : > { %317 = sbr.rel (%p3164_p8) target bundleno = 741 (0x2e5), region = 48  ;;  %s3311_s0 = sand.u32 (!%p3164_p8), 1, %s3062_s25  }
  0x79   : > { %s2126_s26 = sshll.u32 (!%p3164_p8), %s3311_s0, 8  ;;  %s320_s19 = scalar_lea.sflag (!%p3164_p8), [#allocation3], %s3311_s0 }
  0x7a   : > { %s3315_s21 = scalar_lea.vmem (!%p3164_p8), [#allocation2], %s2126_s26  ;;  %p3865_p5 = scmp.ne.s32.totalorder (!%p3164_p8), %s3852_s30, 0 }
  0x7d   : > { %3037 = dma.done.wait (%p3865_p5), %s320_s19, 4096  }
  0x7e   : > { %3039 = vsyncadd (%p3865_p5), %s320_s19, 4294963200  ;;  %s328_s20 = sand.u32 1, %s3145_s28   ;;  %s3322_s10 = scalar_lea.vmem [#allocation5], %s2126_s26 }
  0x7f   : > { %s329_s9 = scalar_lea.sflag [#allocation6], %s328_s20 }
  0x80   : > { %3041 = dma.done.wait (%p3865_p5), %s329_s9, 4096  }
  0x81   : > { %3043 = vsyncadd (%p3865_p5), %s329_s9, 4294963200  ;;  %p3866_p8 = scmp.eq.s32.totalorder %s3145_s28, 0 }
  0x83   : > { %3045 = dma.done.wait (%p3866_p8), [#allocation6], 2048   ;;  %p3867_p11 = pmov %p3866_p8 }
  0x84   : > { %p3868_p3 = pmov %p3866_p8 }
  0x85   : > { %3047 = vsyncadd (%p3867_p11), [#allocation6], 4294965248 }
  0x86   : > { %3049 = dma.done.wait (%p3868_p3), [#allocation9], 10240   ;;  %p3869_p12 = pmov %p3868_p3 }
  0x87   : > { %v459_v0 = vld [vmem:[#allocation7 + $0x78] sm:$0xff]  ;;  %v458_v2 = vld [vmem:[#allocation7 + $0x70] sm:$0xff]  ;;  %v457_v4 = vld [vmem:[#allocation7 + $0x68] sm:$0xff]  ;;  %s2131_s14 = sshll.u32 %s3311_s0, 9  ;;  %s2139_s2 = sshll.u32 %s3145_s28, 13 }
  0x88   : > { %3051 = vsyncadd (%p3869_p12), [#allocation9], 4294957056  ;;  %v892_v1 = vld [vmem:[#allocation8 + $0x78] sm:$0xff]  ;;  %2236 = vmatprep.subr.mxu0 %v459_v0  ;;  %v891_v3 = vld [vmem:[#allocation8 + $0x70] sm:$0xff]  ;;  %s3592_s18 = scalar_lea.vmem [#allocation11], %s2131_s14  ;;  %s3784_s13 = scalar_lea.hbm %s3838_s7, %s2139_s2 }
  0x89   : > { %2316 = vmatprep.subr.mxu1 %v892_v1  ;;  %2237 = vmatpush3.msra.mxu0 %v459_v0  ;;  %v890_v5 = vld [vmem:[#allocation8 + $0x68] sm:$0xff]  ;;  %v456_v6 = vld [vmem:[#allocation7 + $0x60] sm:$0xff]  ;;  %v455_v8 = vld [vmem:[#allocation7 + $0x58] sm:$0xff]  ;;  %s1989_s12 = sshll.u32 %s3592_s18, 4  ;;  %s1976_s15 = scalar_lea.sflag [#allocation4], %s3311_s0  ;;  %s3786_s12 = int_to_ptr.vmem [resolvable:$true] %s1989_s12 }
  0x8a   : > { %2317 = vmatpush3.msra.mxu1 %v892_v1  ;;  %2238 = vmatprep.subr.mxu0 %v458_v2  ;;  %v889_v7 = vld [vmem:[#allocation8 + $0x60] sm:$0xff]  ;;  %v888_v9 = vld [vmem:[#allocation8 + $0x58] sm:$0xff]  ;;  %v454_v10 = vld [vmem:[#allocation7 + $0x50] sm:$0xff]  ;;  %s2994_s28 = scalar_lea.vmem %s3786_s12, 8192  ;;  %p3870_p13 = scmp.ne.s32.totalorder %s3860_s23, 0 }
  0x8b   : > { %2318 = vmatprep.subr.mxu1 %v891_v3  ;;  %2239 = vmatpush3.msra.mxu0 %v458_v2  ;;  %v887_v11 = vld [vmem:[#allocation8 + $0x50] sm:$0xff]  ;;  %v453_v12 = vld [vmem:[#allocation7 + $0x48] sm:$0xff]  ;;  %v452_v14 = vld [vmem:[#allocation7 + $0x40] sm:$0xff]  ;;  %p2995_p9 = scmp.ne.s32.totalorder %s3786_s12, %s2994_s28  ;;  %s3081_s11 = smov [#allocation11]  }
  0x8c   : > { %2319 = vmatpush3.msra.mxu1 %v891_v3  ;;  %2240 = vmatprep.subr.mxu0 %v457_v4  ;;  %v886_v13 = vld [vmem:[#allocation8 + $0x48] sm:$0xff]  ;;  %v885_v15 = vld [vmem:[#allocation8 + $0x40] sm:$0xff]  ;;  %v451_v16 = vld [vmem:[#allocation7 + $0x38] sm:$0xff]  ;;  %s2998_s26 = sshll.u32 %s3081_s11, 4  ;;  %s2999_s26 = int_to_ptr.vmem [resolvable:$false] %s2998_s26 }
  0x8d   : > { %2320 = vmatprep.subr.mxu1 %v890_v5  ;;  %2241 = vmatpush3.msra.mxu0 %v457_v4  ;;  %v884_v17 = vld [vmem:[#allocation8 + $0x38] sm:$0xff]  ;;  %v450_v18 = vld [vmem:[#allocation7 + $0x30] sm:$0xff]  ;;  %v449_v20 = vld [vmem:[#allocation7 + $0x28] sm:$0xff]  ;;  %p2996_p0 = pnand %p2995_p9, %p3870_p13  ;;  %s3000_s19 = scalar_lea.vmem %s2999_s26, 16384 }
  0x8e   : > { %2321 = vmatpush3.msra.mxu1 %v890_v5  ;;  %2242 = vmatprep.subr.mxu0 %v456_v6  ;;  %v883_v19 = vld [vmem:[#allocation8 + $0x30] sm:$0xff]  ;;  %v882_v21 = vld [vmem:[#allocation8 + $0x28] sm:$0xff]  ;;  %v448_v22 = vld [vmem:[#allocation7 + $0x20] sm:$0xff]  ;;  %p3001_p10 = scmp.lt.s32.totalorder %s3786_s12, %s2999_s26  ;;  %p3002_p1 = scmp.lt.s32.totalorder %s3000_s19, %s2994_s28 }
  0x8f   : > { %2322 = vmatprep.subr.mxu1 %v889_v7  ;;  %2243 = vmatpush3.msra.mxu0 %v456_v6  ;;  %v881_v23 = vld [vmem:[#allocation8 + $0x20] sm:$0xff]  ;;  %v447_v24 = vld [vmem:[#allocation7 + $0x18] sm:$0xff]  ;;  %v446_v26 = vld [vmem:[#allocation7 + $0x10] sm:$0xff]  ;;  %p2997_p2 = pneg %p2996_p0 }
  0x90   : > { %2323 = vmatpush3.msra.mxu1 %v889_v7  ;;  %2244 = vmatprep.subr.mxu0 %v455_v8  ;;  %v880_v25 = vld [vmem:[#allocation8 + $0x18] sm:$0xff]  ;;  %v879_v27 = vld [vmem:[#allocation8 + $0x10] sm:$0xff]  ;;  %v445_v28 = vld [vmem:[#allocation7 + $0x8] sm:$0xff]  ;;  %p3003_p4 = por %p3002_p1, %p3001_p10 }
  0x91   : > { %2324 = vmatprep.subr.mxu1 %v888_v9  ;;  %2245 = vmatpush3.msra.mxu0 %v455_v8  ;;  %v878_v29 = vld [vmem:[#allocation8 + $0x8] sm:$0xff]  ;;  %v444_v30 = vld [vmem:[#allocation7] sm:$0xff]  ;;  %v3350_v36 = vld [vmem:[%s3315_s21 + $0x10] sm:$0xff] }
  0x92   : > { %2325 = vmatpush3.msra.mxu1 %v888_v9  ;;  %2246 = vmatprep.subr.mxu0 %v454_v10  ;;  %v877_v31 = vld [vmem:[#allocation8] sm:$0xff]  ;;  %v3343_v34 = vld [vmem:[%s3315_s21 + $0x8] sm:$0xff]  ;;  %v3353_v37 = vld [vmem:[%s3322_s10 + $0x10] sm:$0xff]  ;;  %p3004_p6 = pnand %p3003_p4, %p2997_p2 }
  0x93   : > { %2326 = vmatprep.subr.mxu1 %v887_v11  ;;  %2247 = vmatpush3.msra.mxu0 %v454_v10  ;;  %v3337_v32 = vld [vmem:[%s3315_s21] sm:$0xff]  ;;  %v3346_v35 = vld [vmem:[%s3322_s10 + $0x8] sm:$0xff]  ;;  %v1405_v38 = vld [vmem:[#allocation10 + $0xf8] sm:$0xff] }
  0x94   : > { %2327 = vmatpush3.msra.mxu1 %v887_v11  ;;  %2248 = vmatprep.subr.mxu0 %v453_v12  ;;  %v3340_v33 = vld [vmem:[%s3322_s10] sm:$0xff]  ;;  %v1404_v39 = vld [vmem:[#allocation10 + $0xf0] sm:$0xff]  ;;  %v3361_v40 = vld [vmem:[%s3315_s21 + $0x18] sm:$0xff] }
  0x95   : > { %2328 = vmatprep.subr.mxu1 %v886_v13  ;;  %2249 = vmatpush3.msra.mxu0 %v453_v12  ;;  %v3364_v41 = vld [vmem:[%s3322_s10 + $0x18] sm:$0xff]  ;;  %v384_v42 = vld [vmem:[%s3315_s21 + $0x20] sm:$0xff]  ;;  %v1403_v44 = vld [vmem:[#allocation10 + $0xe8] sm:$0xff] }
  0x96   : > { %2329 = vmatpush3.msra.mxu1 %v886_v13  ;;  %2250 = vmatprep.subr.mxu0 %v452_v14  ;;  %v416_v43 = vld [vmem:[%s3322_s10 + $0x20] sm:$0xff]  ;;  %v385_v46 = vld [vmem:[%s3315_s21 + $0x28] sm:$0xff]  ;;  %v386_v48 = vld [vmem:[%s3315_s21 + $0x30] sm:$0xff] }
  0x97   : > { %2330 = vmatprep.subr.mxu1 %v885_v15  ;;  %2251 = vmatpush3.msra.mxu0 %v452_v14  ;;  %v1402_v45 = vld [vmem:[#allocation10 + $0xe0] sm:$0xff]  ;;  %v417_v47 = vld [vmem:[%s3322_s10 + $0x28] sm:$0xff]  ;;  %v418_v49 = vld [vmem:[%s3322_s10 + $0x30] sm:$0xff] }
  0x98   : > { %2331 = vmatpush3.msra.mxu1 %v885_v15  ;;  %2252 = vmatprep.subr.mxu0 %v451_v16  ;;  %v1401_v50 = vld [vmem:[#allocation10 + $0xd8] sm:$0xff]  ;;  %v1400_v51 = vld [vmem:[#allocation10 + $0xd0] sm:$0xff]  ;;  %v388_v54 = vld [vmem:[%s3315_s21 + $0x40] sm:$0xff] }
  0x99   : > { %2332 = vmatprep.subr.mxu1 %v884_v17  ;;  %2253 = vmatpush3.msra.mxu0 %v451_v16  ;;  %v387_v52 = vld [vmem:[%s3315_s21 + $0x38] sm:$0xff]  ;;  %v420_v55 = vld [vmem:[%s3322_s10 + $0x40] sm:$0xff]  ;;  %v1399_v56 = vld [vmem:[#allocation10 + $0xc8] sm:$0xff] }
  0x9a   : > { %2333 = vmatpush3.msra.mxu1 %v884_v17  ;;  %2254 = vmatprep.subr.mxu0 %v450_v18  ;;  %v419_v53 = vld [vmem:[%s3322_s10 + $0x38] sm:$0xff]  ;;  %v1398_v57 = vld [vmem:[#allocation10 + $0xc0] sm:$0xff]  ;;  %v389_v58 = vld [vmem:[%s3315_s21 + $0x48] sm:$0xff] }
  0x9b   : > { %2334 = vmatprep.subr.mxu1 %v883_v19  ;;  %2255 = vmatpush3.msra.mxu0 %v450_v18  ;;  %v421_v59 = vld [vmem:[%s3322_s10 + $0x48] sm:$0xff]  ;;  %v390_v60 = vld [vmem:[%s3315_s21 + $0x50] sm:$0xff]  ;;  %v1397_v62 = vld [vmem:[#allocation10 + $0xb8] sm:$0xff] }
  0x9c   : > { %2335 = vmatpush3.msra.mxu1 %v883_v19  ;;  %2256 = vmatprep.subr.mxu0 %v449_v20  ;;  %v422_v61 = vld [vmem:[%s3322_s10 + $0x50] sm:$0xff]  ;;  %v391_v0 = vld [vmem:[%s3315_s21 + $0x58] sm:$0xff]  ;;  %v392_v2 = vld [vmem:[%s3315_s21 + $0x60] sm:$0xff] }
  0x9d   : > { %2336 = vmatprep.subr.mxu1 %v882_v21  ;;  %2257 = vmatpush3.msra.mxu0 %v449_v20  ;;  %v1396_v63 = vld [vmem:[#allocation10 + $0xb0] sm:$0xff]  ;;  %v423_v1 = vld [vmem:[%s3322_s10 + $0x58] sm:$0xff]  ;;  %v424_v3 = vld [vmem:[%s3322_s10 + $0x60] sm:$0xff] }
  0x9e   : > { %2337 = vmatpush3.msra.mxu1 %v882_v21  ;;  %2258 = vmatprep.subr.mxu0 %v448_v22  ;;  %v1395_v4 = vld [vmem:[#allocation10 + $0xa8] sm:$0xff]  ;;  %v1394_v5 = vld [vmem:[#allocation10 + $0xa0] sm:$0xff]  ;;  %v394_v8 = vld [vmem:[%s3315_s21 + $0x70] sm:$0xff] }
  0x9f   : > { %2338 = vmatprep.subr.mxu1 %v881_v23  ;;  %2259 = vmatpush3.msra.mxu0 %v448_v22  ;;  %v393_v6 = vld [vmem:[%s3315_s21 + $0x68] sm:$0xff]  ;;  %v426_v9 = vld [vmem:[%s3322_s10 + $0x70] sm:$0xff]  ;;  %v1393_v10 = vld [vmem:[#allocation10 + $0x98] sm:$0xff] }
  0xa0   : > { %2339 = vmatpush3.msra.mxu1 %v881_v23  ;;  %2260 = vmatprep.subr.mxu0 %v447_v24  ;;  %v425_v7 = vld [vmem:[%s3322_s10 + $0x68] sm:$0xff]  ;;  %v1392_v11 = vld [vmem:[#allocation10 + $0x90] sm:$0xff]  ;;  %v395_v12 = vld [vmem:[%s3315_s21 + $0x78] sm:$0xff] }
  0xa1   : > { %2340 = vmatprep.subr.mxu1 %v880_v25  ;;  %2261 = vmatpush3.msra.mxu0 %v447_v24  ;;  %v427_v13 = vld [vmem:[%s3322_s10 + $0x78] sm:$0xff]  ;;  %v396_v14 = vld [vmem:[%s3315_s21 + $0x80] sm:$0xff]  ;;  %v1391_v16 = vld [vmem:[#allocation10 + $0x88] sm:$0xff] }
  0xa2   : > { %2341 = vmatpush3.msra.mxu1 %v880_v25  ;;  %2262 = vmatprep.subr.mxu0 %v446_v26  ;;  %v428_v15 = vld [vmem:[%s3322_s10 + $0x80] sm:$0xff]  ;;  %v397_v18 = vld [vmem:[%s3315_s21 + $0x88] sm:$0xff]  ;;  %v430_v20 = vld [vmem:[%s3322_s10 + $0x90] sm:$0xff] }
  0xa3   : > { %2342 = vmatprep.subr.mxu1 %v879_v27  ;;  %2263 = vmatpush3.msra.mxu0 %v446_v26  ;;  %v1390_v17 = vld [vmem:[#allocation10 + $0x80] sm:$0xff]  ;;  %v429_v19 = vld [vmem:[%s3322_s10 + $0x88] sm:$0xff]  ;;  %v398_v21 = vld [vmem:[%s3315_s21 + $0x90] sm:$0xff] }
  0xa4   : > { %2343 = vmatpush3.msra.mxu1 %v879_v27  ;;  %2264 = vmatprep.subr.mxu0 %v445_v28  ;;  %v1389_v22 = vld [vmem:[#allocation10 + $0x78] sm:$0xff]  ;;  %v1388_v23 = vld [vmem:[#allocation10 + $0x70] sm:$0xff]  ;;  %v432_v26 = vld [vmem:[%s3322_s10 + $0xa0] sm:$0xff] }
  0xa5   : > { %2344 = vmatprep.subr.mxu1 %v878_v29  ;;  %2265 = vmatpush3.msra.mxu0 %v445_v28  ;;  %v431_v24 = vld [vmem:[%s3322_s10 + $0x98] sm:$0xff]  ;;  %v400_v27 = vld [vmem:[%s3315_s21 + $0xa0] sm:$0xff]  ;;  %v1387_v28 = vld [vmem:[#allocation10 + $0x68] sm:$0xff] }
  0xa6   : > { %2345 = vmatpush3.msra.mxu1 %v878_v29  ;;  %2266 = vmatprep.subr.mxu0 %v444_v30  ;;  %v399_v25 = vld [vmem:[%s3315_s21 + $0x98] sm:$0xff]  ;;  %v1386_v29 = vld [vmem:[#allocation10 + $0x60] sm:$0xff] }
  0xa7   : > { %2346 = vmatprep.subr.mxu1 %v877_v31  ;;  %2267 = vmatpush3.msra.mxu0 %v444_v30  ;;  %v433_v30 = vld [vmem:[%s3322_s10 + $0xa8] sm:$0xff] }
  0xa8   : > { %2268 = vmatprep.mubr.f32.mxu0 %v3337_v32  ;;  %2347 = vmatpush3.msra.mxu1 %v877_v31  ;;  %v401_v31 = vld [vmem:[%s3315_s21 + $0xa8] sm:$0xff] }
  0xa9   : > { %2348 = vmatprep.mubr.f32.mxu1 %v3340_v33  ;;  %2269 = vmatmul.mubr.f32.vlgmr.msra.gmra.mxu0 %v3343_v34 }
  0xaa   : > { %2349 = vmatmul.mubr.f32.vlgmr.msra.gmra.mxu1 %v3346_v35  ;;  %2271 = vmatprep.mubr.f32.mxu0 %v3350_v36 }
  0xab   : > { %2351 = vmatprep.mubr.f32.mxu1 %v3353_v37  ;;  %1438 = vmatprep.subr.mxu0 %v1405_v38 }
  0xac   : > { %2396 = vmatprep.subr.mxu1 %v1405_v38  ;;  %1439 = vmatpush1.msra.mxu0 %v1404_v39  ;;  %v434_v38 = vld [vmem:[%s3322_s10 + $0xb0] sm:$0xff] }
  0xad   : > { %2428 = vmatpush1.msra.mxu1 %v1404_v39  ;;  %2272 = vmatmul.mubr.f32.gmra.mxu0 %v3361_v40  ;;  %v402_v39 = vld [vmem:[%s3315_s21 + $0xb0] sm:$0xff] }
  0xae   : > { %2352 = vmatmul.mubr.f32.gmra.mxu1 %v3364_v41  ;;  %2274 = vmatprep.mubr.f32.mxu0 %v384_v42  ;;  %v1385_v42 = vld [vmem:[#allocation10 + $0x58] sm:$0xff] }
  0xaf   : > { %2354 = vmatprep.mubr.f32.mxu1 %v416_v43  ;;  %1440 = vmatprep.subr.mxu0 %v1403_v44  ;;  %v1384_v43 = vld [vmem:[#allocation10 + $0x50] sm:$0xff] }
  0xb0   : > { %2397 = vmatprep.subr.mxu1 %v1403_v44  ;;  %1441 = vmatpush1.msra.mxu0 %v1402_v45  ;;  %v435_v44 = vld [vmem:[%s3322_s10 + $0xb8] sm:$0xff] }
  0xb1   : > { %2429 = vmatpush1.msra.mxu1 %v1402_v45  ;;  %2275 = vmatmul.mubr.f32.gmra.mxu0 %v385_v46  ;;  %v403_v45 = vld [vmem:[%s3315_s21 + $0xb8] sm:$0xff]  ;;  %v436_v46 = vld [vmem:[%s3322_s10 + $0xc0] sm:$0xff] }
  0xb2   : > { %2355 = vmatmul.mubr.f32.gmra.mxu1 %v417_v47  ;;  %2277 = vmatprep.mubr.f32.mxu0 %v386_v48  ;;  %v404_v47 = vld [vmem:[%s3315_s21 + $0xc0] sm:$0xff]  ;;  %v1383_v48 = vld [vmem:[#allocation10 + $0x48] sm:$0xff] }
  0xb3   : > { %2357 = vmatprep.mubr.f32.mxu1 %v418_v49  ;;  %1442 = vmatprep.subr.mxu0 %v1401_v50  ;;  %v1382_v49 = vld [vmem:[#allocation10 + $0x40] sm:$0xff] }
  0xb4   : > { %2398 = vmatprep.subr.mxu1 %v1401_v50  ;;  %1443 = vmatpush1.msra.mxu0 %v1400_v51  ;;  %v437_v50 = vld [vmem:[%s3322_s10 + $0xc8] sm:$0xff] }
  0xb5   : > { %2430 = vmatpush1.msra.mxu1 %v1400_v51  ;;  %2278 = vmatmul.mubr.f32.gmra.mxu0 %v387_v52  ;;  %v405_v51 = vld [vmem:[%s3315_s21 + $0xc8] sm:$0xff]  ;;  %v438_v52 = vld [vmem:[%s3322_s10 + $0xd0] sm:$0xff] }
  0xb6   : > { %2358 = vmatmul.mubr.f32.gmra.mxu1 %v419_v53  ;;  %2280 = vmatprep.mubr.f32.mxu0 %v388_v54  ;;  %v406_v53 = vld [vmem:[%s3315_s21 + $0xd0] sm:$0xff]  ;;  %v439_v54 = vld [vmem:[%s3322_s10 + $0xd8] sm:$0xff] }
  0xb7   : > { %2360 = vmatprep.mubr.f32.mxu1 %v420_v55  ;;  %1444 = vmatprep.subr.mxu0 %v1399_v56  ;;  %v407_v55 = vld [vmem:[%s3315_s21 + $0xd8] sm:$0xff] }
  0xb8   : > { %2399 = vmatprep.subr.mxu1 %v1399_v56  ;;  %1445 = vmatpush1.msra.mxu0 %v1398_v57  ;;  %v440_v56 = vld [vmem:[%s3322_s10 + $0xe0] sm:$0xff] }
  0xb9   : > { %2431 = vmatpush1.msra.mxu1 %v1398_v57  ;;  %2281 = vmatmul.mubr.f32.gmra.mxu0 %v389_v58  ;;  %v408_v57 = vld [vmem:[%s3315_s21 + $0xe0] sm:$0xff]  ;;  %v441_v58 = vld [vmem:[%s3322_s10 + $0xe8] sm:$0xff] }
  0xba   : > { %2361 = vmatmul.mubr.f32.gmra.mxu1 %v421_v59  ;;  %2283 = vmatprep.mubr.f32.mxu0 %v390_v60  ;;  %v409_v59 = vld [vmem:[%s3315_s21 + $0xe8] sm:$0xff]  ;;  %v442_v60 = vld [vmem:[%s3322_s10 + $0xf0] sm:$0xff] }
  0xbb   : > { %2363 = vmatprep.mubr.f32.mxu1 %v422_v61  ;;  %1446 = vmatprep.subr.mxu0 %v1397_v62  ;;  %v410_v61 = vld [vmem:[%s3315_s21 + $0xf0] sm:$0xff] }
  0xbc   : > { %2400 = vmatprep.subr.mxu1 %v1397_v62  ;;  %1447 = vmatpush1.msra.mxu0 %v1396_v63  ;;  %v443_v62 = vld [vmem:[%s3322_s10 + $0xf8] sm:$0xff] }
  0xbd   : > { %2432 = vmatpush1.msra.mxu1 %v1396_v63  ;;  %2284 = vmatmul.mubr.f32.gmra.mxu0 %v391_v0  ;;  %v411_v63 = vld [vmem:[%s3315_s21 + $0xf8] sm:$0xff] }
  0xbe   : > { %2364 = vmatmul.mubr.f32.gmra.mxu1 %v423_v1  ;;  %2286 = vmatprep.mubr.f32.mxu0 %v392_v2  ;;  %v1381_v0 = vld [vmem:[#allocation10 + $0x38] sm:$0xff]  ;;  %v1380_v1 = vld [vmem:[#allocation10 + $0x30] sm:$0xff]  ;;  %v1379_v2 = vld [vmem:[#allocation10 + $0x28] sm:$0xff] }
  0xbf   : > { %2366 = vmatprep.mubr.f32.mxu1 %v424_v3  ;;  %1448 = vmatprep.subr.mxu0 %v1395_v4  ;;  %v1378_v3 = vld [vmem:[#allocation10 + $0x20] sm:$0xff] }
  0xc0   : > { %2401 = vmatprep.subr.mxu1 %v1395_v4  ;;  %1449 = vmatpush1.msra.mxu0 %v1394_v5  ;;  %v1377_v4 = vld [vmem:[#allocation10 + $0x18] sm:$0xff] }
  0xc1   : > { %2433 = vmatpush1.msra.mxu1 %v1394_v5  ;;  %2287 = vmatmul.mubr.f32.gmra.mxu0 %v393_v6  ;;  %v1376_v5 = vld [vmem:[#allocation10 + $0x10] sm:$0xff]  ;;  %v1375_v6 = vld [vmem:[#allocation10 + $0x8] sm:$0xff] }
  0xc2   : > { %2367 = vmatmul.mubr.f32.gmra.mxu1 %v425_v7  ;;  %2289 = vmatprep.mubr.f32.mxu0 %v394_v8  ;;  %v1374_v7 = vld [vmem:[#allocation10] sm:$0xff]  ;;  %v1437_v8 = vld [vmem:[#allocation10 + $0x1f8] sm:$0xff] }
  0xc3   : > { %2369 = vmatprep.mubr.f32.mxu1 %v426_v9  ;;  %1450 = vmatprep.subr.mxu0 %v1393_v10  ;;  %v1436_v9 = vld [vmem:[#allocation10 + $0x1f0] sm:$0xff] }
  0xc4   : > { %2402 = vmatprep.subr.mxu1 %v1393_v10  ;;  %1451 = vmatpush1.msra.mxu0 %v1392_v11  ;;  %v1435_v10 = vld [vmem:[#allocation10 + $0x1e8] sm:$0xff] }
  0xc5   : > { %2434 = vmatpush1.msra.mxu1 %v1392_v11  ;;  %2290 = vmatmul.mubr.f32.gmra.mxu0 %v395_v12  ;;  %v1434_v11 = vld [vmem:[#allocation10 + $0x1e0] sm:$0xff]  ;;  %v1433_v12 = vld [vmem:[#allocation10 + $0x1d8] sm:$0xff] }
  0xc6   : > { %2370 = vmatmul.mubr.f32.gmra.mxu1 %v427_v13  ;;  %2292 = vmatprep.mubr.f32.mxu0 %v396_v14  ;;  %v1432_v13 = vld [vmem:[#allocation10 + $0x1d0] sm:$0xff]  ;;  %v1431_v14 = vld [vmem:[#allocation10 + $0x1c8] sm:$0xff] }
  0xc7   : > { %2372 = vmatprep.mubr.f32.mxu1 %v428_v15  ;;  %1452 = vmatprep.subr.mxu0 %v1391_v16  ;;  %v1430_v15 = vld [vmem:[#allocation10 + $0x1c0] sm:$0xff] }
  0xc8   : > { %2403 = vmatprep.subr.mxu1 %v1391_v16  ;;  %1453 = vmatpush1.msra.mxu0 %v1390_v17  ;;  %v1429_v16 = vld [vmem:[#allocation10 + $0x1b8] sm:$0xff] }
  0xc9   : > { %2435 = vmatpush1.msra.mxu1 %v1390_v17  ;;  %2293 = vmatmul.mubr.f32.gmra.mxu0 %v397_v18  ;;  %v1428_v17 = vld [vmem:[#allocation10 + $0x1b0] sm:$0xff]  ;;  %v1427_v18 = vld [vmem:[#allocation10 + $0x1a8] sm:$0xff] }
  0xca   : > { %2373 = vmatmul.mubr.f32.gmra.mxu1 %v429_v19  ;;  %2295 = vmatprep.mubr.f32.mxu0 %v398_v21  ;;  %v1426_v19 = vld [vmem:[#allocation10 + $0x1a0] sm:$0xff]  ;;  %v1424_v21 = vld [vmem:[#allocation10 + $0x190] sm:$0xff] }
  0xcb   : > { %2375 = vmatprep.mubr.f32.mxu1 %v430_v20  ;;  %1454 = vmatprep.subr.mxu0 %v1389_v22  ;;  %v1425_v20 = vld [vmem:[#allocation10 + $0x198] sm:$0xff] }
  0xcc   : > { %2404 = vmatprep.subr.mxu1 %v1389_v22  ;;  %1455 = vmatpush1.msra.mxu0 %v1388_v23  ;;  %v1423_v22 = vld [vmem:[#allocation10 + $0x188] sm:$0xff] }
  0xcd   : > { %2436 = vmatpush1.msra.mxu1 %v1388_v23  ;;  %2296 = vmatmul.mubr.f32.gmra.mxu0 %v399_v25  ;;  %v1422_v23 = vld [vmem:[#allocation10 + $0x180] sm:$0xff]  ;;  %v1420_v25 = vld [vmem:[#allocation10 + $0x170] sm:$0xff] }
  0xce   : > { %2376 = vmatmul.mubr.f32.gmra.mxu1 %v431_v24  ;;  %2298 = vmatprep.mubr.f32.mxu0 %v400_v27  ;;  %v1421_v24 = vld [vmem:[#allocation10 + $0x178] sm:$0xff]  ;;  %v1418_v27 = vld [vmem:[#allocation10 + $0x160] sm:$0xff] }
  0xcf   : > { %2378 = vmatprep.mubr.f32.mxu1 %v432_v26  ;;  %1456 = vmatprep.subr.mxu0 %v1387_v28  ;;  %v1419_v26 = vld [vmem:[#allocation10 + $0x168] sm:$0xff] }
  0xd0   : > { %2405 = vmatprep.subr.mxu1 %v1387_v28  ;;  %1457 = vmatpush1.msra.mxu0 %v1386_v29  ;;  %v1417_v28 = vld [vmem:[#allocation10 + $0x158] sm:$0xff] }
  0xd1   : > { %2437 = vmatpush1.msra.mxu1 %v1386_v29  ;;  %2299 = vmatmul.mubr.f32.gmra.mxu0 %v401_v31  ;;  %v1416_v29 = vld [vmem:[#allocation10 + $0x150] sm:$0xff]  ;;  %v1414_v31 = vld [vmem:[#allocation10 + $0x140] sm:$0xff] }
  0xd2   : > { %2379 = vmatmul.mubr.f32.gmra.mxu1 %v433_v30  ;;  %2301 = vmatprep.mubr.f32.mxu0 %v402_v39  ;;  %v1415_v30 = vld [vmem:[#allocation10 + $0x148] sm:$0xff]  ;;  %v1412_v39 = vld [vmem:[#allocation10 + $0x130] sm:$0xff] }
  0xd3   : > { %2381 = vmatprep.mubr.f32.mxu1 %v434_v38  ;;  %1458 = vmatprep.subr.mxu0 %v1385_v42  ;;  %v1413_v38 = vld [vmem:[#allocation10 + $0x138] sm:$0xff] }
  0xd4   : > { %2406 = vmatprep.subr.mxu1 %v1385_v42  ;;  %1459 = vmatpush1.msra.mxu0 %v1384_v43  ;;  %v1411_v42 = vld [vmem:[#allocation10 + $0x128] sm:$0xff] }
  0xd5   : > { %2438 = vmatpush1.msra.mxu1 %v1384_v43  ;;  %2302 = vmatmul.mubr.f32.gmra.mxu0 %v403_v45  ;;  %v1410_v43 = vld [vmem:[#allocation10 + $0x120] sm:$0xff]  ;;  %v1408_v45 = vld [vmem:[#allocation10 + $0x110] sm:$0xff] }
  0xd6   : > { %2382 = vmatmul.mubr.f32.gmra.mxu1 %v435_v44  ;;  %2304 = vmatprep.mubr.f32.mxu0 %v404_v47  ;;  %v1409_v44 = vld [vmem:[#allocation10 + $0x118] sm:$0xff]  ;;  %v1406_v47 = vld [vmem:[#allocation10 + $0x100] sm:$0xff] }
  0xd7   : > { %2384 = vmatprep.mubr.f32.mxu1 %v436_v46  ;;  %1460 = vmatprep.subr.mxu0 %v1383_v48  ;;  %v1407_v46 = vld [vmem:[#allocation10 + $0x108] sm:$0xff] }
  0xd8   : > { %2407 = vmatprep.subr.mxu1 %v1383_v48  ;;  %1461 = vmatpush1.msra.mxu0 %v1382_v49 }
  0xd9   : > { %2439 = vmatpush1.msra.mxu1 %v1382_v49  ;;  %2305 = vmatmul.mubr.f32.gmra.mxu0 %v405_v51 }
  0xda   : > { %2385 = vmatmul.mubr.f32.gmra.mxu1 %v437_v50  ;;  %2307 = vmatprep.mubr.f32.mxu0 %v406_v53 }
  0xdb   : > { %2387 = vmatprep.mubr.f32.mxu1 %v438_v52  ;;  %1462 = vmatprep.subr.mxu0 %v1381_v0 }
  0xdc   : > { %2408 = vmatprep.subr.mxu1 %v1381_v0  ;;  %1463 = vmatpush1.msra.mxu0 %v1380_v1 }
  0xdd   : > { %2308 = vmatmul.mubr.f32.gmra.mxu0 %v407_v55  ;;  %2440 = vmatpush1.msra.mxu1 %v1380_v1 }
  0xde   : > { %2388 = vmatmul.mubr.f32.gmra.mxu1 %v439_v54  ;;  %2310 = vmatprep.mubr.f32.mxu0 %v408_v57 }
  0xdf   : > { %2390 = vmatprep.mubr.f32.mxu1 %v440_v56  ;;  %1464 = vmatprep.subr.mxu0 %v1379_v2 }
  0xe0   : > { %2409 = vmatprep.subr.mxu1 %v1379_v2  ;;  %1465 = vmatpush1.msra.mxu0 %v1378_v3 }
  0xe1   : > { %2311 = vmatmul.mubr.f32.gmra.mxu0 %v409_v59  ;;  %2441 = vmatpush1.msra.mxu1 %v1378_v3 }
  0xe2   : > { %2391 = vmatmul.mubr.f32.gmra.mxu1 %v441_v58  ;;  %2313 = vmatprep.mubr.f32.mxu0 %v410_v61 }
  0xe3   : > { %2393 = vmatprep.mubr.f32.mxu1 %v442_v60  ;;  %1466 = vmatprep.subr.mxu0 %v1377_v4 }
  0xe4   : > { %2410 = vmatprep.subr.mxu1 %v1377_v4  ;;  %1467 = vmatpush1.msra.mxu0 %v1376_v5 }
  0xe5   : > { %2314 = vmatmul.mubr.f32.gmra.mxu0 %v411_v63  ;;  %2442 = vmatpush1.msra.mxu1 %v1376_v5 }
  0xe6   : > { %2394 = vmatmul.mubr.f32.gmra.mxu1 %v443_v62  ;;  %1468 = vmatprep.subr.mxu0 %v1375_v6 }
  0xe7   : > { %2411 = vmatprep.subr.mxu1 %v1375_v6  ;;  %1469 = vmatpush1.msra.mxu0 %v1374_v7 }
  0xe8   : > { %2443 = vmatpush1.msra.mxu1 %v1374_v7  ;;  %1470 = vmatprep.subr.mxu0 %v1437_v8 }
  0xe9   : > { %2412 = vmatprep.subr.mxu1 %v1437_v8  ;;  %1471 = vmatpush2.msra.mxu0 %v1436_v9 }
  0xea   : > { %2444 = vmatpush2.msra.mxu1 %v1436_v9  ;;  %1472 = vmatprep.subr.mxu0 %v1435_v10 }
  0xeb   : > { %2413 = vmatprep.subr.mxu1 %v1435_v10  ;;  %1473 = vmatpush2.msra.mxu0 %v1434_v11 }
  0xec   : > { %2445 = vmatpush2.msra.mxu1 %v1434_v11  ;;  %1474 = vmatprep.subr.mxu0 %v1433_v12 }
  0xed   : > { %2414 = vmatprep.subr.mxu1 %v1433_v12  ;;  %1475 = vmatpush2.msra.mxu0 %v1432_v13 }
  0xee   : > { %2446 = vmatpush2.msra.mxu1 %v1432_v13  ;;  %1476 = vmatprep.subr.mxu0 %v1431_v14 }
  0xef   : > { %2415 = vmatprep.subr.mxu1 %v1431_v14  ;;  %1477 = vmatpush2.msra.mxu0 %v1430_v15 }
  0xf0   : > { %2447 = vmatpush2.msra.mxu1 %v1430_v15  ;;  %1478 = vmatprep.subr.mxu0 %v1429_v16 }
  0xf1   : > { %2416 = vmatprep.subr.mxu1 %v1429_v16  ;;  %1479 = vmatpush2.msra.mxu0 %v1428_v17 }
  0xf2   : > { %2448 = vmatpush2.msra.mxu1 %v1428_v17  ;;  %1480 = vmatprep.subr.mxu0 %v1427_v18 }
  0xf3   : > { %2417 = vmatprep.subr.mxu1 %v1427_v18  ;;  %1481 = vmatpush2.msra.mxu0 %v1426_v19 }
  0xf4   : > { %2449 = vmatpush2.msra.mxu1 %v1426_v19  ;;  %1482 = vmatprep.subr.mxu0 %v1425_v20 }
  0xf5   : > { %2418 = vmatprep.subr.mxu1 %v1425_v20  ;;  %1483 = vmatpush2.msra.mxu0 %v1424_v21 }
  0xf6   : > { %2450 = vmatpush2.msra.mxu1 %v1424_v21  ;;  %1484 = vmatprep.subr.mxu0 %v1423_v22 }
  0xf7   : > { %2419 = vmatprep.subr.mxu1 %v1423_v22  ;;  %1485 = vmatpush2.msra.mxu0 %v1422_v23 }
  0xf8   : > { %2451 = vmatpush2.msra.mxu1 %v1422_v23  ;;  %1486 = vmatprep.subr.mxu0 %v1421_v24 }
  0xf9   : > { %2420 = vmatprep.subr.mxu1 %v1421_v24  ;;  %1487 = vmatpush2.msra.mxu0 %v1420_v25 }
  0xfa   : > { %2452 = vmatpush2.msra.mxu1 %v1420_v25  ;;  %1488 = vmatprep.subr.mxu0 %v1419_v26 }
  0xfb   : > { %2421 = vmatprep.subr.mxu1 %v1419_v26  ;;  %1489 = vmatpush2.msra.mxu0 %v1418_v27 }
  0xfc   : > { %2453 = vmatpush2.msra.mxu1 %v1418_v27  ;;  %1490 = vmatprep.subr.mxu0 %v1417_v28 }
  0xfd   : > { %2422 = vmatprep.subr.mxu1 %v1417_v28  ;;  %1491 = vmatpush2.msra.mxu0 %v1416_v29 }
  0xfe   : > { %2454 = vmatpush2.msra.mxu1 %v1416_v29  ;;  %1492 = vmatprep.subr.mxu0 %v1415_v30 }
  0xff   : > { %2423 = vmatprep.subr.mxu1 %v1415_v30  ;;  %1493 = vmatpush2.msra.mxu0 %v1414_v31 }
 0x100   : > { %2455 = vmatpush2.msra.mxu1 %v1414_v31  ;;  %1494 = vmatprep.subr.mxu0 %v1413_v38 }
 0x101   : > { %2424 = vmatprep.subr.mxu1 %v1413_v38  ;;  %1495 = vmatpush2.msra.mxu0 %v1412_v39 }
 0x102   : > { %2456 = vmatpush2.msra.mxu1 %v1412_v39  ;;  %1496 = vmatprep.subr.mxu0 %v1411_v42 }
 0x103   : > { %2425 = vmatprep.subr.mxu1 %v1411_v42  ;;  %1497 = vmatpush2.msra.mxu0 %v1410_v43 }
 0x104   : > { %2457 = vmatpush2.msra.mxu1 %v1410_v43  ;;  %1498 = vmatprep.subr.mxu0 %v1409_v44 }
 0x105   : > { %2426 = vmatprep.subr.mxu1 %v1409_v44  ;;  %1499 = vmatpush2.msra.mxu0 %v1408_v45 }
 0x106   : > { %2458 = vmatpush2.msra.mxu1 %v1408_v45  ;;  %1500 = vmatprep.subr.mxu0 %v1407_v46 }
 0x107   : > { %2427 = vmatprep.subr.mxu1 %v1407_v46  ;;  %1501 = vmatpush2.msra.mxu0 %v1406_v47 }
 0x108   : > { %2459 = vmatpush2.msra.mxu1 %v1406_v47 }
 0x169   : > { %v2270_v48 = vpop.f32.mrf.mxu0 }
 0x16a   : > { %v2350_v49 = vpop.f32.mrf.mxu1  ;;  %v686_v50 = vsub.f32 0.0, %v2270_v48 }
 0x16b   : > { %v1119_v51 = vsub.f32 0.0, %v2350_v49  ;;  %v526_v52 = vpop.f32.mrf.mxu0 }
 0x16c   : > { %v959_v53 = vpop.f32.mrf.mxu1  ;;  %v719_v54 = vmul.f32 1.442695, %v686_v50  ;;  %v685_v56 = vsub.f32 0.0, %v526_v52 }
 0x16d   : > { %v1152_v55 = vmul.f32 1.442695, %v1119_v51  ;;  %v1118_v57 = vsub.f32 0.0, %v959_v53  ;;  %v2273_v58 = vpop.f32.mrf.mxu0 }
 0x16e   : > { %v2353_v59 = vpop.f32.mrf.mxu1  ;;  %2548 = vpow2.f32 %v719_v54  ;;  %v717_v60 = vmul.f32 1.442695, %v685_v56  ;;  %v688_v62 = vsub.f32 0.0, %v2273_v58 }
 0x16f   : > { %v1150_v61 = vmul.f32 1.442695, %v1118_v57  ;;  %2550 = vpow2.f32 %v1152_v55  ;;  %v1121_v63 = vsub.f32 0.0, %v2353_v59  ;;  %v536_v0 = vpop.f32.mrf.mxu0 }
 0x170   : > { %v969_v1 = vpop.f32.mrf.mxu1  ;;  %2552 = vpow2.f32 %v717_v60  ;;  %v723_v2 = vmul.f32 1.442695, %v688_v62  ;;  %v687_v3 = vsub.f32 0.0, %v536_v0 }
 0x171   : > { %v1120_v4 = vsub.f32 0.0, %v969_v1  ;;  %2554 = vpow2.f32 %v1150_v61  ;;  %v1156_v5 = vmul.f32 1.442695, %v1121_v63  ;;  %v2276_v6 = vpop.f32.mrf.mxu0 }
 0x172   : > { %v2356_v7 = vpop.f32.mrf.mxu1  ;;  %2556 = vpow2.f32 %v723_v2  ;;  %v721_v8 = vmul.f32 1.442695, %v687_v3  ;;  %v690_v10 = vsub.f32 0.0, %v2276_v6 }
 0x173   : > { %v1154_v9 = vmul.f32 1.442695, %v1120_v4  ;;  %2558 = vpow2.f32 %v1156_v5  ;;  %v1123_v11 = vsub.f32 0.0, %v2356_v7  ;;  %v546_v12 = vpop.f32.mrf.mxu0 }
 0x174   : > { %v979_v13 = vpop.f32.mrf.mxu1  ;;  %2560 = vpow2.f32 %v721_v8  ;;  %v727_v14 = vmul.f32 1.442695, %v690_v10  ;;  %v689_v15 = vsub.f32 0.0, %v546_v12 }
 0x175   : > { %v1122_v16 = vsub.f32 0.0, %v979_v13  ;;  %2562 = vpow2.f32 %v1154_v9  ;;  %v1160_v17 = vmul.f32 1.442695, %v1123_v11  ;;  %v2279_v18 = vpop.f32.mrf.mxu0 }
 0x176   : > { %v2359_v19 = vpop.f32.mrf.mxu1  ;;  %2564 = vpow2.f32 %v727_v14  ;;  %v725_v20 = vmul.f32 1.442695, %v689_v15  ;;  %v692_v22 = vsub.f32 0.0, %v2279_v18 }
 0x177   : > { %v1158_v21 = vmul.f32 1.442695, %v1122_v16  ;;  %2566 = vpow2.f32 %v1160_v17  ;;  %v1125_v23 = vsub.f32 0.0, %v2359_v19  ;;  %v556_v24 = vpop.f32.mrf.mxu0 }
 0x178   : > { %v989_v25 = vpop.f32.mrf.mxu1  ;;  %2568 = vpow2.f32 %v725_v20  ;;  %v691_v26 = vsub.f32 0.0, %v556_v24  ;;  %v731_v31 = vmul.f32 1.442695, %v692_v22 }
 0x179   : > { %v1124_v27 = vsub.f32 0.0, %v989_v25  ;;  %2570 = vpow2.f32 %v1158_v21  ;;  %v1164_v28 = vmul.f32 1.442695, %v1125_v23  ;;  %v2282_v29 = vpop.f32.mrf.mxu0 }
 0x17a   : > { %v3424_v30 = vpop.f32.mrf.mxu1  ;;  %v729_v38 = vmul.f32 1.442695, %v691_v26  ;;  %v694_v5 = vsub.f32 0.0, %v2282_v29 }
 0x17b   : > { %v1162_v39 = vmul.f32 1.442695, %v1124_v27  ;;  %v2549_v42 = vpop.eup %2548  ;;  %2572 = vpow2.f32 %v1164_v28  ;;  %v3426_v43 = vpop.f32.mrf.mxu0  ;;  %v1127_v11 = vsub.f32 0.0, %v3424_v30 }
 0x17c   : > { %v3428_v44 = vpop.f32.mrf.mxu1  ;;  %v2551_v45 = vpop.eup %2550  ;;  %2574 = vpow2.f32 %v729_v38  ;;  %v782_v50 = vadd.f32 1.0, %v2549_v42  ;;  %v693_v13 = vsub.f32 0.0, %v3426_v43  ;;  %v735_v16 = vmul.f32 1.442695, %v694_v5 }
 0x17d   : > { %v2553_v46 = vpop.eup %2552  ;;  %v1215_v47 = vadd.f32 1.0, %v2551_v45  ;;  %2576 = vpow2.f32 %v1162_v39  ;;  %v3430_v48 = vpop.f32.mrf.mxu0  ;;  %v1126_v17 = vsub.f32 0.0, %v3428_v44  ;;  %v1168_v26 = vmul.f32 1.442695, %v1127_v11 }
 0x17e   : > { %v2555_v49 = vpop.eup %2554  ;;  %v781_v51 = vadd.f32 1.0, %v2553_v46  ;;  %2578 = vpow2.f32 %v731_v31  ;;  %v3432_v52 = vpop.f32.mrf.mxu1  ;;  %v696_v21 = vsub.f32 0.0, %v3430_v48  ;;  %v733_v28 = vmul.f32 1.442695, %v693_v13 }
 0x17f   : > { %v2557_v53 = vpop.eup %2556  ;;  %2580 = vrcp.f32 %v1215_v47  ;;  %v1214_v54 = vadd.f32 1.0, %v2555_v49  ;;  %v3434_v59 = vpop.f32.mrf.mxu0  ;;  %v1129_v22 = vsub.f32 0.0, %v3432_v52  ;;  %v1166_v31 = vmul.f32 1.442695, %v1126_v17 }
 0x180   : > { %v2559_v55 = vpop.eup %2558  ;;  %2582 = vrcp.f32 %v781_v51  ;;  %v784_v56 = vadd.f32 1.0, %v2557_v53  ;;  %v3436_v62 = vpop.f32.mrf.mxu1  ;;  %v695_v29 = vsub.f32 0.0, %v3434_v59  ;;  %v739_v43 = vmul.f32 1.442695, %v696_v21 }
 0x181   : > { %v2561_v57 = vpop.eup %2560  ;;  %2584 = vrcp.f32 %v1214_v54  ;;  %v1217_v58 = vadd.f32 1.0, %v2559_v55  ;;  %v2288_v6 = vpop.f32.mrf.mxu0  ;;  %v1128_v38 = vsub.f32 0.0, %v3436_v62  ;;  %v1172_v44 = vmul.f32 1.442695, %v1129_v22  ;;  %v2804_v22 = vld [vmem:[%s3322_s10 + $0x20] sm:$0xff] }
 0x182   : > { %v2563_v60 = vpop.eup %2562  ;;  %2586 = vrcp.f32 %v782_v50  ;;  %v783_v61 = vadd.f32 1.0, %v2561_v57  ;;  %v2368_v9 = vpop.f32.mrf.mxu1  ;;  %v698_v45 = vsub.f32 0.0, %v2288_v6  ;;  %v737_v52 = vmul.f32 1.442695, %v695_v29 }
 0x183   : > { %v2565_v63 = vpop.eup %2564  ;;  %2588 = vrcp.f32 %v784_v56  ;;  %v1216_v0 = vadd.f32 1.0, %v2563_v60  ;;  %v586_v18 = vpop.f32.mrf.mxu0  ;;  %v1131_v48 = vsub.f32 0.0, %v2368_v9  ;;  %v1170_v55 = vmul.f32 1.442695, %v1128_v38 }
 0x184   : > { %v2567_v1 = vpop.eup %2566  ;;  %2590 = vrcp.f32 %v1217_v58  ;;  %v786_v2 = vadd.f32 1.0, %v2565_v63  ;;  %v1019_v23 = vpop.f32.mrf.mxu1  ;;  %v697_v53 = vsub.f32 0.0, %v586_v18  ;;  %v743_v60 = vmul.f32 1.442695, %v698_v45 }
 0x185   : > { %v2569_v3 = vpop.eup %2568  ;;  %2592 = vrcp.f32 %v1216_v0  ;;  %v1219_v4 = vadd.f32 1.0, %v2567_v1  ;;  %v2291_v39 = vpop.f32.mrf.mxu0  ;;  %v1130_v56 = vsub.f32 0.0, %v1019_v23 }
 0x186   : > { %v2571_v7 = vpop.eup %2570  ;;  %2594 = vrcp.f32 %v783_v61  ;;  %v785_v8 = vadd.f32 1.0, %v2569_v3  ;;  %v2371_v46 = vpop.f32.mrf.mxu1  ;;  %v741_v0 = vmul.f32 1.442695, %v697_v53 }
 0x187   : > { %2596 = vrcp.f32 %v786_v2  ;;  %v1218_v10 = vadd.f32 1.0, %v2571_v7  ;;  %v596_v57 = vpop.f32.mrf.mxu0  ;;  %v1133_v62 = vsub.f32 0.0, %v2371_v46 }
 0x188   : > { %v2573_v12 = vpop.eup %2572  ;;  %2598 = vrcp.f32 %v1219_v4  ;;  %v1029_v61 = vpop.f32.mrf.mxu1  ;;  %v699_v1 = vsub.f32 0.0, %v596_v57 }
 0x189   : > { %v2575_v14 = vpop.eup %2574  ;;  %2600 = vrcp.f32 %v785_v8  ;;  %v1221_v15 = vadd.f32 1.0, %v2573_v12  ;;  %v1132_v4 = vsub.f32 0.0, %v1029_v61  ;;  %v700_v8 = vsub.f32 0.0, %v2291_v39 }
 0x18a   : > { %v2577_v19 = vpop.eup %2576  ;;  %2602 = vrcp.f32 %v1218_v10  ;;  %v787_v20 = vadd.f32 1.0, %v2575_v14  ;;  %v1180_v10 = vmul.f32 1.442695, %v1133_v62  ;;  %v745_v12 = vmul.f32 1.442695, %v699_v1  ;;  %v3459_v21 = vpop.f32.mrf.mxu1 }
 0x18b   : > { %v2579_v24 = vpop.eup %2578  ;;  %2604 = vrcp.f32 %v1221_v15  ;;  %v1220_v25 = vadd.f32 1.0, %v2577_v19  ;;  %v1178_v14 = vmul.f32 1.442695, %v1132_v4 }
 0x18c   : > { %v2581_v27 = vpop.eup %2580  ;;  %2606 = vrcp.f32 %v787_v20  ;;  %v788_v7 = vadd.f32 1.0, %v2579_v24 }
 0x18d   : > { %v2583_v30 = vpop.eup %2582  ;;  %2608 = vrcp.f32 %v1220_v25  ;;  %v1343_v58 = vmul.f32 %v2581_v27, %v3346_v35  ;;  %v1174_v35 = vmul.f32 1.442695, %v1130_v56 }
 0x18e   : > { %v2585_v42 = vpop.eup %2584  ;;  %2610 = vpow2.f32 %v735_v16  ;;  %v1310_v50 = vmul.f32 %v2583_v30, %v3337_v32  ;;  %v1176_v32 = vmul.f32 1.442695, %v1131_v48  ;;  %v747_v16 = vmul.f32 1.442695, %v700_v8  ;;  %v2805_v30 = vld [vmem:[%s3315_s21 + $0x20] sm:$0xff] }
 0x18f   : > { %v2587_v47 = vpop.eup %2586  ;;  %2612 = vpow2.f32 %v1168_v26  ;;  %v1342_v49 = vmul.f32 %v2585_v42, %v3340_v33  ;;  %v3462_v26 = vpop.f32.mrf.mxu0 }
 0x190   : > { %v2589_v51 = vpop.eup %2588  ;;  %2614 = vpow2.f32 %v733_v28  ;;  %v1311_v2 = vmul.f32 %v2587_v47, %v3343_v34  ;;  %v3465_v42 = vpop.f32.mrf.mxu1 }
 0x191   : > { %v2591_v54 = vpop.eup %2590  ;;  %2616 = vpow2.f32 %v1166_v31  ;;  %1502 = vmatprep.mubr.f32.mxu0 %v1342_v49  ;;  %v1313_v19 = vmul.f32 %v2589_v51, %v3361_v40  ;;  %v606_v47 = vpop.f32.mrf.mxu0 }
 0x192   : > { %v2593_v59 = vpop.eup %2592  ;;  %2618 = vpow2.f32 %v739_v43  ;;  %1503 = vmatmul.mubr.f32.vlgmr.msra.gmra.mxu0 %v1310_v50  ;;  %v2806_v43 = vld [vmem:[%s3322_s10 + $0x28] sm:$0xff]  ;;  %v3468_v50 = vpop.f32.mrf.mxu1 }
 0x193   : > { %v2595_v33 = vpop.eup %2594  ;;  %2620 = vpow2.f32 %v1172_v44  ;;  %1508 = vmatprep.mubr.f32.mxu0 %v1343_v58  ;;  %v1344_v5 = vmul.f32 %v2593_v59, %v3353_v37  ;;  %v1345_v37 = vmul.f32 %v2591_v54, %v3364_v41  ;;  %v3470_v53 = vpop.f32.mrf.mxu0  ;;  %v2807_v54 = vld [vmem:[%s3315_s21 + $0x28] sm:$0xff]  ;;  %v2808_v58 = vld [vmem:[%s3322_s10 + $0x30] sm:$0xff] }
 0x194   : > { %v3448_v63 = vpop.eup %2596  ;;  %2622 = vpow2.f32 %v737_v52  ;;  %v1312_v34 = vmul.f32 %v2595_v33, %v3350_v36  ;;  %v702_v33 = vsub.f32 0.0, %v3462_v26  ;;  %v1049_v1 = vpop.f32.mrf.mxu1 }
 0x195   : > { %v2599_v3 = vpop.eup %2598  ;;  %2624 = vpow2.f32 %v1170_v55  ;;  %v1315_v55 = vmul.f32 %v2807_v54, %v3448_v63 }
 0x196   : > { %v2601_v6 = vpop.eup %2600  ;;  %2626 = vpow2.f32 %v743_v60  ;;  %1509 = vmatmul.mubr.f32.gmra.mxu0 %v1311_v2  ;;  %v1347_v44 = vmul.f32 %v2806_v43, %v2599_v3  ;;  %v701_v2 = vsub.f32 0.0, %v606_v47  ;;  %v616_v3 = vpop.f32.mrf.mxu0 }
 0x197   : > { %v2603_v9 = vpop.eup %2602  ;;  %2628 = vpow2.f32 %v1176_v32  ;;  %1514 = vmatprep.mubr.f32.mxu0 %v1344_v5  ;;  %v1314_v31 = vmul.f32 %v2805_v30, %v2601_v6  ;;  %v2380_v8 = vpop.f32.mrf.mxu1 }
 0x198   : > { %v3452_v11 = vpop.eup %2604  ;;  %2630 = vpow2.f32 %v741_v0  ;;  %v1346_v23 = vmul.f32 %v2804_v22, %v2603_v9  ;;  %v1135_v0 = vsub.f32 0.0, %v3459_v21  ;;  %v2810_v9 = vld [vmem:[%s3322_s10 + $0x38] sm:$0xff] }
 0x199   : > { %v3455_v13 = vpop.eup %2606  ;;  %2632 = vpow2.f32 %v1174_v35  ;;  %v2809_v35 = vld [vmem:[%s3315_s21 + $0x30] sm:$0xff] }
 0x19a   : > { %v2609_v15 = vpop.eup %2608  ;;  %2634 = vrcp.f32 %v788_v7  ;;  %1515 = vmatmul.mubr.f32.gmra.mxu0 %v1312_v34  ;;  %v1316_v4 = vmul.f32 %v2809_v35, %v3455_v13  ;;  %v1134_v7 = vsub.f32 0.0, %v3465_v42 }
 0x19b   : > { %v2611_v17 = vpop.eup %2610  ;;  %2636 = vpow2.f32 %v1180_v10  ;;  %1520 = vmatprep.mubr.f32.mxu0 %v1345_v37  ;;  %v1348_v59 = vmul.f32 %v2808_v58, %v2609_v15  ;;  %v1349_v10 = vmul.f32 %v2810_v9, %v3452_v11  ;;  %v1137_v37 = vsub.f32 0.0, %v3468_v50  ;;  %v2300_v15 = vpop.f32.mrf.mxu0  ;;  %v2814_v50 = vld [vmem:[%s3322_s10 + $0x48] sm:$0xff] }
 0x19c   : > { %v2613_v18 = vpop.eup %2612  ;;  %2638 = vpow2.f32 %v745_v12  ;;  %v790_v24 = vadd.f32 1.0, %v2611_v17  ;;  %v1184_v17 = vmul.f32 1.442695, %v1135_v0  ;;  %v749_v11 = vmul.f32 1.442695, %v701_v2 }
 0x19d   : > { %v2615_v20 = vpop.eup %2614  ;;  %v1223_v36 = vadd.f32 1.0, %v2613_v18  ;;  %2640 = vpow2.f32 %v1178_v14  ;;  %v751_v14 = vmul.f32 1.442695, %v702_v33  ;;  %v704_v18 = vsub.f32 0.0, %v3470_v53 }
 0x19e   : > { %v2617_v41 = vpop.eup %2616  ;;  %v789_v25 = vadd.f32 1.0, %v2615_v20  ;;  %2642 = vpow2.f32 %v747_v16  ;;  %1521 = vmatmul.mubr.f32.gmra.mxu0 %v1313_v19  ;;  %v1136_v20 = vsub.f32 0.0, %v1049_v1  ;;  %v1188_v26 = vmul.f32 1.442695, %v1137_v37 }
 0x19f   : > { %v2619_v27 = vpop.eup %2618  ;;  %2644 = vrcp.f32 %v1223_v36  ;;  %v1222_v28 = vadd.f32 1.0, %v2617_v41  ;;  %1526 = vmatprep.mubr.f32.mxu0 %v1346_v23  ;;  %v2811_v36 = vld [vmem:[%s3315_s21 + $0x38] sm:$0xff]  ;;  %v1182_v23 = vmul.f32 1.442695, %v1134_v7  ;;  %v703_v41 = vsub.f32 0.0, %v616_v3 }
 0x1a0   : > { %v2621_v40 = vpop.eup %2620  ;;  %2646 = vrcp.f32 %v789_v25  ;;  %v792_v29 = vadd.f32 1.0, %v2619_v27  ;;  %v1139_v27 = vsub.f32 0.0, %v2380_v8  ;;  %v706_v30 = vsub.f32 0.0, %v2300_v15  ;;  %v2818_v8 = vld [vmem:[%s3322_s10 + $0x58] sm:$0xff] }
 0x1a1   : > { %v2623_v38 = vpop.eup %2622  ;;  %2648 = vrcp.f32 %v1222_v28  ;;  %v1225_v39 = vadd.f32 1.0, %v2621_v40  ;;  %v626_v28 = vpop.f32.mrf.mxu0  ;;  %v1186_v43 = vmul.f32 1.442695, %v1136_v20  ;;  %v2819_v15 = vld [vmem:[%s3315_s21 + $0x58] sm:$0xff] }
 0x1a2   : > { %v2625_v45 = vpop.eup %2624  ;;  %2650 = vrcp.f32 %v790_v24  ;;  %v791_v46 = vadd.f32 1.0, %v2623_v38  ;;  %1527 = vmatmul.mubr.f32.gmra.mxu0 %v1314_v31  ;;  %v1059_v24 = vpop.f32.mrf.mxu1  ;;  %v2812_v38 = vld [vmem:[%s3322_s10 + $0x40] sm:$0xff]  ;;  %v1192_v53 = vmul.f32 1.442695, %v1139_v27 }
 0x1a3   : > { %v2627_v48 = vpop.eup %2626  ;;  %2652 = vrcp.f32 %v792_v29  ;;  %v1224_v49 = vadd.f32 1.0, %v2625_v45  ;;  %1532 = vmatprep.mubr.f32.mxu0 %v1347_v44  ;;  %v755_v29 = vmul.f32 1.442695, %v704_v18  ;;  %v1138_v44 = vsub.f32 0.0, %v1059_v24  ;;  %v2813_v45 = vld [vmem:[%s3315_s21 + $0x40] sm:$0xff] }
 0x1a4   : > { %v2629_v51 = vpop.eup %2628  ;;  %2654 = vrcp.f32 %v1225_v39  ;;  %v794_v52 = vadd.f32 1.0, %v2627_v48  ;;  %v3487_v31 = vpop.f32.mrf.mxu1  ;;  %v753_v48 = vmul.f32 1.442695, %v703_v41 }
 0x1a5   : > { %v2631_v56 = vpop.eup %2630  ;;  %2656 = vrcp.f32 %v1224_v49  ;;  %v1227_v57 = vadd.f32 1.0, %v2629_v51  ;;  %v705_v49 = vsub.f32 0.0, %v626_v28  ;;  %v1141_v18 = vsub.f32 0.0, %v3487_v31  ;;  %v2821_v28 = vld [vmem:[%s3315_s21 + $0x60] sm:$0xff] }
 0x1a6   : > { %v2633_v60 = vpop.eup %2632  ;;  %2658 = vrcp.f32 %v791_v46  ;;  %v793_v61 = vadd.f32 1.0, %v2631_v56  ;;  %1533 = vmatmul.mubr.f32.gmra.mxu0 %v1315_v55  ;;  %v759_v55 = vmul.f32 1.442695, %v706_v30  ;;  %v3492_v56 = vpop.f32.mrf.mxu0 }
 0x1a7   : > { %v2635_v32 = vpop.eup %2634  ;;  %2660 = vrcp.f32 %v794_v52  ;;  %v1226_v62 = vadd.f32 1.0, %v2633_v60  ;;  %1538 = vmatprep.mubr.f32.mxu0 %v1348_v59  ;;  %v1190_v59 = vmul.f32 1.442695, %v1138_v44  ;;  %v2815_v60 = vld [vmem:[%s3315_s21 + $0x48] sm:$0xff]  ;;  %v1196_v30 = vmul.f32 1.442695, %v1141_v18 }
 0x1a8   : > { %v2637_v63 = vpop.eup %2636  ;;  %2662 = vrcp.f32 %v1227_v57  ;;  %v1317_v21 = vmul.f32 %v2811_v36, %v2635_v32  ;;  %v1069_v57 = vpop.f32.mrf.mxu1  ;;  %v757_v32 = vmul.f32 1.442695, %v705_v49 }
 0x1a9   : > { %v2639_v5 = vpop.eup %2638  ;;  %2664 = vrcp.f32 %v793_v61  ;;  %v1229_v6 = vadd.f32 1.0, %v2637_v63  ;;  %v1140_v63 = vsub.f32 0.0, %v1069_v57  ;;  %v636_v3 = vpop.f32.mrf.mxu0 }
 0x1aa   : > { %v2641_v12 = vpop.eup %2640  ;;  %2666 = vrcp.f32 %v1226_v62  ;;  %v795_v34 = vadd.f32 1.0, %v2639_v5  ;;  %1539 = vmatmul.mubr.f32.gmra.mxu0 %v1316_v4  ;;  %v2816_v62 = vld [vmem:[%s3322_s10 + $0x50] sm:$0xff] }
 0x1ab   : > { %v3483_v16 = vpop.eup %2642  ;;  %2668 = vrcp.f32 %v1229_v6  ;;  %v1228_v13 = vadd.f32 1.0, %v2641_v12  ;;  %1544 = vmatprep.mubr.f32.mxu0 %v1349_v10  ;;  %v2817_v5 = vld [vmem:[%s3315_s21 + $0x50] sm:$0xff]  ;;  %v1194_v12 = vmul.f32 1.442695, %v1140_v63  ;;  %v2306_v27 = vpop.f32.mrf.mxu0 }
 0x1ac   : > { %v2645_v19 = vpop.eup %2644  ;;  %2670 = vrcp.f32 %v795_v34  ;;  %v796_v4 = vadd.f32 1.0, %v3483_v16  ;;  %v707_v34 = vsub.f32 0.0, %v636_v3 }
 0x1ad   : > { %v2647_v22 = vpop.eup %2646  ;;  %2672 = vrcp.f32 %v1228_v13  ;;  %v1351_v51 = vmul.f32 %v2814_v50, %v2645_v19  ;;  %v3507_v19 = vpop.f32.mrf.mxu1 }
 0x1ae   : > { %v2649_v25 = vpop.eup %2648  ;;  %2674 = vpow2.f32 %v751_v14  ;;  %1545 = vmatmul.mubr.f32.gmra.mxu0 %v1317_v21  ;;  %v1318_v46 = vmul.f32 %v2813_v45, %v2647_v22  ;;  %v708_v22 = vsub.f32 0.0, %v3492_v56  ;;  %v646_v50 = vpop.f32.mrf.mxu0 }
 0x1af   : > { %v2651_v40 = vpop.eup %2650  ;;  %2676 = vpow2.f32 %v1184_v17  ;;  %v1350_v39 = vmul.f32 %v2812_v38, %v2649_v25  ;;  %v1079_v31 = vpop.f32.mrf.mxu1  ;;  %v2822_v38 = vld [vmem:[%s3322_s10 + $0x68] sm:$0xff] }
 0x1b0   : > { %v2653_v42 = vpop.eup %2652  ;;  %2678 = vpow2.f32 %v749_v11  ;;  %v1319_v61 = vmul.f32 %v2815_v60, %v2651_v40  ;;  %v2820_v11 = vld [vmem:[%s3322_s10 + $0x60] sm:$0xff]  ;;  %v763_v44 = vmul.f32 1.442695, %v708_v22  ;;  %v1143_v60 = vsub.f32 0.0, %v3507_v19 }
 0x1b1   : > { %v2655_v47 = vpop.eup %2654  ;;  %2680 = vpow2.f32 %v1182_v23  ;;  %1550 = vmatprep.mubr.f32.mxu0 %v1350_v39  ;;  %v1321_v16 = vmul.f32 %v2819_v15, %v2653_v42  ;;  %v761_v23 = vmul.f32 1.442695, %v707_v34 }
 0x1b2   : > { %v2657_v52 = vpop.eup %2656  ;;  %2682 = vpow2.f32 %v1188_v26  ;;  %1551 = vmatmul.mubr.f32.gmra.mxu0 %v1318_v46  ;;  %v1353_v9 = vmul.f32 %v2818_v8, %v2655_v47  ;;  %v3513_v47 = vpop.f32.mrf.mxu1 }
 0x1b3   : > { %v2659_v54 = vpop.eup %2658  ;;  %2684 = vpow2.f32 %v755_v29  ;;  %1556 = vmatprep.mubr.f32.mxu0 %v1351_v51  ;;  %v1352_v0 = vmul.f32 %v2816_v62, %v2657_v52  ;;  %v2823_v51 = vld [vmem:[%s3315_s21 + $0x68] sm:$0xff] }
 0x1b4   : > { %v3494_v58 = vpop.eup %2660  ;;  %2686 = vpow2.f32 %v1186_v43  ;;  %v1320_v6 = vmul.f32 %v2817_v5, %v2659_v54  ;;  %v1089_v62 = vpop.f32.mrf.mxu1 }
 0x1b5   : > { %v2663_v33 = vpop.eup %2662  ;;  %2688 = vpow2.f32 %v753_v48  ;;  %v1323_v52 = vmul.f32 %v2823_v51, %v3494_v58  ;;  %v1144_v15 = vsub.f32 0.0, %v1089_v62 }
 0x1b6   : > { %v2665_v1 = vpop.eup %2664  ;;  %2690 = vpow2.f32 %v1192_v53  ;;  %1557 = vmatmul.mubr.f32.gmra.mxu0 %v1319_v61  ;;  %v1355_v39 = vmul.f32 %v2822_v38, %v2663_v33  ;;  %v3519_v61 = vpop.f32.mrf.mxu0  ;;  %v2830_v38 = vld [vmem:[%s3322_s10 + $0x88] sm:$0xff] }
 0x1b7   : > { %v2667_v2 = vpop.eup %2666  ;;  %2692 = vpow2.f32 %v759_v55  ;;  %1562 = vmatprep.mubr.f32.mxu0 %v1352_v0  ;;  %v1322_v40 = vmul.f32 %v2821_v28, %v2665_v1  ;;  %v2824_v55 = vld [vmem:[%s3322_s10 + $0x70] sm:$0xff]  ;;  %v1142_v0 = vsub.f32 0.0, %v1079_v31  ;;  %v3523_v5 = vpop.f32.mrf.mxu1 }
 0x1b8   : > { %v3498_v35 = vpop.eup %2668  ;;  %2694 = vpow2.f32 %v1190_v59  ;;  %v1354_v20 = vmul.f32 %v2820_v11, %v2667_v2  ;;  %v2825_v1 = vld [vmem:[%s3315_s21 + $0x70] sm:$0xff] }
 0x1b9   : > { %v3502_v7 = vpop.eup %2670  ;;  %2696 = vpow2.f32 %v757_v32  ;;  %v710_v32 = vsub.f32 0.0, %v2306_v27  ;;  %v1099_v11 = vpop.f32.mrf.mxu1 }
 0x1ba   : > { %v2673_v10 = vpop.eup %2672  ;;  %1563 = vmatmul.mubr.f32.gmra.mxu0 %v1320_v6  ;;  %2698 = vrcp.f32 %v796_v4  ;;  %v1324_v63 = vmul.f32 %v2825_v1, %v3502_v7  ;;  %v709_v4 = vsub.f32 0.0, %v646_v50  ;;  %v2826_v6 = vld [vmem:[%s3322_s10 + $0x78] sm:$0xff] }
 0x1bb   : > { %v2675_v14 = vpop.eup %2674  ;;  %1568 = vmatprep.mubr.f32.mxu0 %v1353_v9  ;;  %2700 = vpow2.f32 %v1194_v12  ;;  %v1356_v56 = vmul.f32 %v2824_v55, %v2673_v10  ;;  %v1357_v8 = vmul.f32 %v2826_v6, %v3498_v35  ;;  %v1200_v9 = vmul.f32 1.442695, %v1143_v60  ;;  %v656_v10 = vpop.f32.mrf.mxu0  ;;  %v2834_v6 = vld [vmem:[%s3322_s10 + $0x98] sm:$0xff] }
 0x1bc   : > { %v2677_v37 = vpop.eup %2676  ;;  %v798_v24 = vadd.f32 1.0, %v2675_v14  ;;  %v767_v34 = vmul.f32 1.442695, %v710_v32  ;;  %v1145_v14 = vsub.f32 0.0, %v3513_v47  ;;  %v765_v35 = vmul.f32 1.442695, %v709_v4  ;;  %v3534_v27 = vpop.f32.mrf.mxu1 }
 0x1bd   : > { %v2679_v13 = vpop.eup %2678  ;;  %v1231_v17 = vadd.f32 1.0, %v2677_v37  ;;  %v1198_v37 = vmul.f32 1.442695, %v1142_v0  ;;  %v711_v18 = vsub.f32 0.0, %v656_v10  ;;  %v3529_v19 = vpop.f32.mrf.mxu0  ;;  %v2831_v47 = vld [vmem:[%s3322_s10 + $0x90] sm:$0xff] }
 0x1be   : > { %v2681_v36 = vpop.eup %2680  ;;  %v797_v21 = vadd.f32 1.0, %v2679_v13  ;;  %1569 = vmatmul.mubr.f32.gmra.mxu0 %v1321_v16  ;;  %v2827_v16 = vld [vmem:[%s3315_s21 + $0x78] sm:$0xff]  ;;  %v1109_v51 = vpop.f32.mrf.mxu1  ;;  %v714_v60 = vsub.f32 0.0, %v3529_v19 }
 0x1bf   : > { %v2683_v41 = vpop.eup %2682  ;;  %2702 = vrcp.f32 %v1231_v17  ;;  %v1230_v25 = vadd.f32 1.0, %v2681_v36  ;;  %1574 = vmatprep.mubr.f32.mxu0 %v1354_v20  ;;  %v769_v31 = vmul.f32 1.442695, %v711_v18  ;;  %v1148_v32 = vsub.f32 0.0, %v1109_v51 }
 0x1c0   : > { %v2685_v26 = vpop.eup %2684  ;;  %2704 = vrcp.f32 %v797_v21  ;;  %v1233_v46 = vadd.f32 1.0, %v2683_v41  ;;  %v2828_v21 = vld [vmem:[%s3315_s21 + $0x80] sm:$0xff]  ;;  %v1204_v41 = vmul.f32 1.442695, %v1145_v14 }
 0x1c1   : > { %v2687_v29 = vpop.eup %2686  ;;  %2706 = vrcp.f32 %v1230_v25  ;;  %v800_v54 = vadd.f32 1.0, %v2685_v26  ;;  %v2829_v25 = vld [vmem:[%s3322_s10 + $0x80] sm:$0xff]  ;;  %v1210_v10 = vmul.f32 1.442695, %v1148_v32  ;;  %v2843_v32 = vld [vmem:[%s3315_s21 + $0xb8] sm:$0xff] }
 0x1c2   : > { %v2689_v42 = vpop.eup %2688  ;;  %v1232_v43 = vadd.f32 1.0, %v2687_v29  ;;  %2708 = vpow2.f32 %v761_v23  ;;  %1575 = vmatmul.mubr.f32.gmra.mxu0 %v1322_v40  ;;  %v1202_v40 = vmul.f32 1.442695, %v1144_v15  ;;  %v1146_v29 = vsub.f32 0.0, %v1099_v11  ;;  %v2835_v14 = vld [vmem:[%s3322_s10 + $0xa0] sm:$0xff] }
 0x1c3   : > { %v2691_v45 = vpop.eup %2690  ;;  %2710 = vrcp.f32 %v798_v24  ;;  %1580 = vmatprep.mubr.f32.mxu0 %v1355_v39  ;;  %v799_v49 = vadd.f32 1.0, %v2689_v42  ;;  %v712_v24 = vsub.f32 0.0, %v3519_v61  ;;  %v666_v42 = vpop.f32.mrf.mxu0 }
 0x1c4   : > { %v2693_v48 = vpop.eup %2692  ;;  %2712 = vrcp.f32 %v1232_v43  ;;  %v1235_v59 = vadd.f32 1.0, %v2691_v45  ;;  %v1206_v55 = vmul.f32 1.442695, %v1146_v29 }
 0x1c5   : > { %v2695_v53 = vpop.eup %2694  ;;  %2714 = vpow2.f32 %v1196_v30  ;;  %v802_v58 = vadd.f32 1.0, %v2693_v48  ;;  %v3539_v50 = vpop.f32.mrf.mxu0 }
 0x1c6   : > { %v2697_v57 = vpop.eup %2696  ;;  %2716 = vpow2.f32 %v763_v44  ;;  %1581 = vmatmul.mubr.f32.gmra.mxu0 %v1323_v52  ;;  %v1234_v33 = vadd.f32 1.0, %v2695_v53  ;;  %v2832_v53 = vld [vmem:[%s3315_s21 + $0x88] sm:$0xff] }
 0x1c7   : > { %2718 = vrcp.f32 %v1233_v46  ;;  %1586 = vmatprep.mubr.f32.mxu0 %v1356_v56  ;;  %v2699_v2 = vpop.eup %2698  ;;  %v801_v3 = vadd.f32 1.0, %v2697_v57  ;;  %v771_v46 = vmul.f32 1.442695, %v712_v24  ;;  %v713_v56 = vsub.f32 0.0, %v666_v42  ;;  %v676_v0 = vpop.f32.mrf.mxu0 }
 0x1c8   : > { %2720 = vrcp.f32 %v799_v49  ;;  %v2701_v12 = vpop.eup %2700  ;;  %v1325_v13 = vmul.f32 %v2827_v16, %v2699_v2  ;;  %v1147_v49 = vsub.f32 0.0, %v3523_v5  ;;  %v775_v5 = vmul.f32 1.442695, %v714_v60  ;;  %v2836_v16 = vld [vmem:[%s3315_s21 + $0x98] sm:$0xff] }
 0x1c9   : > { %2722 = vrcp.f32 %v800_v54  ;;  %v1236_v36 = vadd.f32 1.0, %v2701_v12  ;;  %v715_v12 = vsub.f32 0.0, %v676_v0 }
 0x1ca   : > { %2724 = vrcp.f32 %v1235_v59  ;;  %1587 = vmatmul.mubr.f32.gmra.mxu0 %v1324_v63  ;;  %v2833_v63 = vld [vmem:[%s3315_s21 + $0x90] sm:$0xff] }
 0x1cb   : > { %2726 = vrcp.f32 %v1234_v33  ;;  %1592 = vmatprep.mubr.f32.mxu0 %v1357_v8  ;;  %v777_v11 = vmul.f32 1.442695, %v715_v12  ;;  %v2846_v12 = vld [vmem:[%s3322_s10 + $0xc8] sm:$0xff] }
 0x1cc   : > { %v2703_v7 = vpop.eup %2702  ;;  %2728 = vrcp.f32 %v802_v58  ;;  %v1208_v58 = vmul.f32 1.442695, %v1147_v49 }
 0x1cd   : > { %v2705_v17 = vpop.eup %2704  ;;  %2730 = vrcp.f32 %v801_v3  ;;  %v1359_v39 = vmul.f32 %v2830_v38, %v2703_v7  ;;  %v773_v3 = vmul.f32 1.442695, %v713_v56  ;;  %v2839_v38 = vld [vmem:[%s3322_s10 + $0xb0] sm:$0xff]  ;;  %v2842_v56 = vld [vmem:[%s3322_s10 + $0xb8] sm:$0xff] }
 0x1ce   : > { %v2707_v20 = vpop.eup %2706  ;;  %2732 = vpow2.f32 %v1200_v9  ;;  %v1326_v22 = vmul.f32 %v2828_v21, %v2705_v17  ;;  %1593 = vmatmul.mubr.f32.gmra.mxu0 %v1325_v13 }
 0x1cf   : > { %v2709_v23 = vpop.eup %2708  ;;  %2734 = vpow2.f32 %v767_v34  ;;  %v1358_v26 = vmul.f32 %v2829_v25, %v2707_v20 }
 0x1d0   : > { %v2711_v28 = vpop.eup %2710  ;;  %2736 = vpow2.f32 %v1198_v37  ;;  %v803_v44 = vadd.f32 1.0, %v2709_v23 }
 0x1d1   : > { %v2713_v30 = vpop.eup %2712  ;;  %2738 = vpow2.f32 %v765_v35  ;;  %1598 = vmatprep.mubr.f32.mxu1 %v1358_v26  ;;  %v1327_v54 = vmul.f32 %v2832_v53, %v2711_v28  ;;  %v1149_v35 = vsub.f32 0.0, %v3534_v27  ;;  %v2838_v27 = vld [vmem:[%s3322_s10 + $0xa8] sm:$0xff]  ;;  %v2841_v53 = vld [vmem:[%s3315_s21 + $0xb0] sm:$0xff] }
 0x1d2   : > { %v2715_v43 = vpop.eup %2714  ;;  %2740 = vrcp.f32 %v1236_v36  ;;  %1599 = vmatmul.mubr.f32.vlgmr.msra.gmra.mxu1 %v1326_v22  ;;  %v1360_v48 = vmul.f32 %v2831_v47, %v2713_v30  ;;  %v716_v22 = vsub.f32 0.0, %v3539_v50 }
 0x1d3   : > { %v2717_v45 = vpop.eup %2716  ;;  %2742 = vpow2.f32 %v1204_v41  ;;  %1604 = vmatprep.mubr.f32.mxu1 %v1359_v39  ;;  %v1237_v59 = vadd.f32 1.0, %v2715_v43  ;;  %v2837_v41 = vld [vmem:[%s3315_s21 + $0xa0] sm:$0xff]  ;;  %v1212_v26 = vmul.f32 1.442695, %v1149_v35 }
 0x1d4   : > { %v2719_v52 = vpop.eup %2718  ;;  %2744 = vpow2.f32 %v1202_v40  ;;  %v804_v33 = vadd.f32 1.0, %v2717_v45 }
 0x1d5   : > { %v2721_v57 = vpop.eup %2720  ;;  %2746 = vpow2.f32 %v769_v31  ;;  %v1361_v8 = vmul.f32 %v2834_v6, %v2719_v52  ;;  %v779_v31 = vmul.f32 1.442695, %v716_v22 }
 0x1d6   : > { %v2723_v61 = vpop.eup %2722  ;;  %2748 = vrcp.f32 %v803_v44  ;;  %1605 = vmatmul.mubr.f32.gmra.mxu1 %v1327_v54  ;;  %v1328_v2 = vmul.f32 %v2833_v63, %v2721_v57  ;;  %v2840_v44 = vld [vmem:[%s3315_s21 + $0xa8] sm:$0xff]  ;;  %v2844_v63 = vld [vmem:[%s3322_s10 + $0xc0] sm:$0xff] }
 0x1d7   : > { %v2725_v62 = vpop.eup %2724  ;;  %2750 = vpow2.f32 %v771_v46  ;;  %1610 = vmatprep.mubr.f32.mxu1 %v1360_v48  ;;  %v1329_v13 = vmul.f32 %v2836_v16, %v2723_v61 }
 0x1d8   : > { %v2727_v1 = vpop.eup %2726  ;;  %2752 = vpow2.f32 %v1206_v55  ;;  %v1363_v28 = vmul.f32 %v2838_v27, %v2725_v62 }
 0x1d9   : > { %v2729_v4 = vpop.eup %2728  ;;  %2754 = vrcp.f32 %v1237_v59  ;;  %v1362_v7 = vmul.f32 %v2835_v14, %v2727_v1 }
 0x1da   : > { %v2731_v9 = vpop.eup %2730  ;;  %2756 = vrcp.f32 %v804_v33  ;;  %1611 = vmatmul.mubr.f32.gmra.mxu1 %v1328_v2  ;;  %v1331_v45 = vmul.f32 %v2840_v44, %v2729_v4 }
 0x1db   : > { %v2733_v34 = vpop.eup %2732  ;;  %2758 = vpow2.f32 %v1208_v58  ;;  %1616 = vmatprep.mubr.f32.mxu1 %v1361_v8  ;;  %v1330_v24 = vmul.f32 %v2837_v41, %v2731_v9  ;;  %v2845_v8 = vld [vmem:[%s3315_s21 + $0xc0] sm:$0xff] }
 0x1dc   : > { %v2735_v37 = vpop.eup %2734  ;;  %v1239_v15 = vadd.f32 1.0, %v2733_v34  ;;  %2760 = vpow2.f32 %v773_v3 }
 0x1dd   : > { %v2737_v17 = vpop.eup %2736  ;;  %2762 = vpow2.f32 %v775_v5  ;;  %v806_v36 = vadd.f32 1.0, %v2735_v37 }
 0x1de   : > { %v2739_v18 = vpop.eup %2738  ;;  %v1238_v19 = vadd.f32 1.0, %v2737_v17  ;;  %1617 = vmatmul.mubr.f32.gmra.mxu1 %v1329_v13  ;;  %2764 = vpow2.f32 %v1210_v10  ;;  %v2848_v13 = vld [vmem:[%s3315_s21 + $0xc8] sm:$0xff] }
 0x1df   : > { %v2741_v20 = vpop.eup %2740  ;;  %2766 = vrcp.f32 %v1239_v15  ;;  %v805_v21 = vadd.f32 1.0, %v2739_v18  ;;  %1622 = vmatprep.mubr.f32.mxu1 %v1362_v7  ;;  %v2847_v7 = vld [vmem:[%s3322_s10 + $0xd0] sm:$0xff] }
 0x1e0   : > { %v2743_v23 = vpop.eup %2742  ;;  %2768 = vrcp.f32 %v1238_v19  ;;  %v1364_v39 = vmul.f32 %v2839_v38, %v2741_v20 }
 0x1e1   : > { %v2745_v25 = vpop.eup %2744  ;;  %2770 = vrcp.f32 %v805_v21  ;;  %v1241_v47 = vadd.f32 1.0, %v2743_v23  ;;  %v2850_v23 = vld [vmem:[%s3322_s10 + $0xd8] sm:$0xff] }
 0x1e2   : > { %v2747_v40 = vpop.eup %2746  ;;  %v1240_v29 = vadd.f32 1.0, %v2745_v25  ;;  %1623 = vmatmul.mubr.f32.gmra.mxu1 %v1330_v24  ;;  %2772 = vpow2.f32 %v777_v11  ;;  %v2851_v24 = vld [vmem:[%s3322_s10 + $0xe0] sm:$0xff] }
 0x1e3   : > { %v2749_v30 = vpop.eup %2748  ;;  %2774 = vrcp.f32 %v806_v36  ;;  %1628 = vmatprep.mubr.f32.mxu1 %v1363_v28  ;;  %v807_v43 = vadd.f32 1.0, %v2747_v40  ;;  %v2849_v36 = vld [vmem:[%s3315_s21 + $0xd0] sm:$0xff] }
 0x1e4   : > { %v2751_v42 = vpop.eup %2750  ;;  %2776 = vrcp.f32 %v1240_v29  ;;  %v1332_v54 = vmul.f32 %v2841_v53, %v2749_v30  ;;  %v2853_v30 = vld [vmem:[%s3315_s21 + $0xe0] sm:$0xff] }
 0x1e5   : > { %v2753_v46 = vpop.eup %2752  ;;  %2778 = vpow2.f32 %v1212_v26  ;;  %v808_v52 = vadd.f32 1.0, %v2751_v42  ;;  %v2852_v26 = vld [vmem:[%s3315_s21 + $0xd8] sm:$0xff] }
 0x1e6   : > { %v2755_v48 = vpop.eup %2754  ;;  %1629 = vmatmul.mubr.f32.gmra.mxu1 %v1331_v45  ;;  %v1242_v50 = vadd.f32 1.0, %v2753_v46  ;;  %2780 = vpow2.f32 %v779_v31  ;;  %v2856_v45 = vld [vmem:[%s3315_s21 + $0xe8] sm:$0xff] }
 0x1e7   : > { %v2757_v49 = vpop.eup %2756  ;;  %1634 = vmatprep.mubr.f32.mxu1 %v1364_v39  ;;  %2782 = vrcp.f32 %v807_v43  ;;  %v1365_v57 = vmul.f32 %v2842_v56, %v2755_v48  ;;  %v2854_v39 = vld [vmem:[%s3322_s10 + $0xe8] sm:$0xff]  ;;  %v2855_v43 = vld [vmem:[%s3322_s10 + $0xf0] sm:$0xff]  ;;  %v1697_v56 = vlaneseq }
 0x1e8   : > { %v2759_v51 = vpop.eup %2758  ;;  %2784 = vrcp.f32 %v1241_v47  ;;  %v1333_v62 = vmul.f32 %v2843_v32, %v2757_v49  ;;  %v2857_v49 = vld [vmem:[%s3315_s21 + $0xf0] sm:$0xff] }
 0x1e9   : > { %v2761_v55 = vpop.eup %2760  ;;  %2786 = vrcp.f32 %v1242_v50  ;;  %v1243_v0 = vadd.f32 1.0, %v2759_v51 }
 0x1ea   : > { %v2763_v59 = vpop.eup %2762  ;;  %1635 = vmatmul.mubr.f32.gmra.mxu1 %v1332_v54  ;;  %2788 = vrcp.f32 %v808_v52  ;;  %v809_v33 = vadd.f32 1.0, %v2761_v55  ;;  %v2858_v52 = vld [vmem:[%s3322_s10 + $0xf8] sm:$0xff] }
 0x1eb   : > { %v2765_v60 = vpop.eup %2764  ;;  %1640 = vmatprep.mubr.f32.mxu1 %v1365_v57  ;;  %v810_v6 = vadd.f32 1.0, %v2763_v59  ;;  %v2859_v54 = vld [vmem:[%s3315_s21 + $0xf8] sm:$0xff]  ;;  %v1698_v57 = vshrl.u32 %v1697_v56, 7 }
 0x1ec   : > { %v2767_v61 = vpop.eup %2766  ;;  %v1244_v4 = vadd.f32 1.0, %v2765_v60  ;;  %2790 = vrcp.f32 %v809_v33  ;;  %v1695_v60 = vld [vmem:[%s3836_s5] sm:$0x3] }
 0x1ed   : > { %v2769_v58 = vpop.eup %2768  ;;  %2792 = vrcp.f32 %v1243_v0  ;;  %v1367_v34 = vmul.f32 %v2846_v12, %v2767_v61  ;;  %v1699_v59 = vsub.s32 0, %v1698_v57  ;;  %v1703_v61 = vsub.s32 1, %v1698_v57  ;;  %v1771_v33 = vld [vmem:[%s3837_s6] sm:$0x3] }
 0x1ee   : > { %v2771_v1 = vpop.eup %2770  ;;  %1641 = vmatmul.mubr.f32.gmra.mxu1 %v1333_v62  ;;  %v1366_v2 = vmul.f32 %v2844_v63, %v2769_v58  ;;  %2794 = vrcp.f32 %v1244_v4 }
 0x1ef   : > { %v2773_v3 = vpop.eup %2772  ;;  %v1334_v9 = vmul.f32 %v2845_v8, %v2771_v1  ;;  %2796 = vrcp.f32 %v810_v6  ;;  %v3578_v32 = vrot.slane %v1695_v60, %v1699_v59  ;;  %v3580_v62 = vrot.slane %v1771_v33, %v1699_v59 }
 0x1f0   : > { %v2775_v5 = vpop.eup %2774  ;;  %1646 = vmatprep.mubr.f32.mxu1 %v1366_v2  ;;  %v811_v16 = vadd.f32 1.0, %v2773_v3  ;;  %v3582_v58 = vrot.slane %v1695_v60, %v1703_v61  ;;  %v3586_v63 = vrot.slane %v1771_v33, %v1703_v61 }
 0x1f1   : > { %v2777_v10 = vpop.eup %2776  ;;  %v1335_v17 = vmul.f32 %v2848_v13, %v2775_v5 }
 0x1f2   : > { %v2779_v14 = vpop.eup %2778  ;;  %1647 = vmatmul.mubr.f32.gmra.mxu1 %v1334_v9  ;;  %v1368_v37 = vmul.f32 %v2847_v7, %v2777_v10  ;;  %2798 = vrcp.f32 %v811_v16 }
 0x1f3   : > { %1652 = vmatprep.mubr.f32.mxu1 %v1367_v34  ;;  %v2781_v15 = vpop.eup %2780  ;;  %v1245_v18 = vadd.f32 1.0, %v2779_v14 }
 0x1f4   : > { %v2783_v35 = vpop.eup %2782  ;;  %v812_v20 = vadd.f32 1.0, %v2781_v15 }
 0x1f5   : > { %v2785_v19 = vpop.eup %2784  ;;  %v1336_v21 = vmul.f32 %v2849_v36, %v2783_v35  ;;  %2800 = vrcp.f32 %v1245_v18 }
 0x1f6   : > { %1653 = vmatmul.mubr.f32.gmra.mxu1 %v1335_v17  ;;  %v2787_v11 = vpop.eup %2786  ;;  %v1369_v41 = vmul.f32 %v2850_v23, %v2785_v19  ;;  %2802 = vrcp.f32 %v812_v20 }
 0x1f7   : > { %1658 = vmatprep.mubr.f32.mxu1 %v1368_v37  ;;  %v2789_v22 = vpop.eup %2788  ;;  %v1370_v25 = vmul.f32 %v2851_v24, %v2787_v11 }
 0x1f8   : > { %v1337_v27 = vmul.f32 %v2852_v26, %v2789_v22 }
 0x1f9   : > { %v2791_v28 = vpop.eup %2790 }
 0x1fa   : > { %1659 = vmatmul.mubr.f32.gmra.mxu1 %v1336_v21  ;;  %v2793_v40 = vpop.eup %2792  ;;  %v1338_v31 = vmul.f32 %v2853_v30, %v2791_v28 }
 0x1fb   : > { %1664 = vmatprep.mubr.f32.mxu1 %v1369_v41  ;;  %v2795_v29 = vpop.eup %2794  ;;  %v1371_v42 = vmul.f32 %v2854_v39, %v2793_v40 }
 0x1fc   : > { %v2797_v38 = vpop.eup %2796  ;;  %v1372_v44 = vmul.f32 %v2855_v43, %v2795_v29 }
 0x1fd   : > { %v1339_v46 = vmul.f32 %v2856_v45, %v2797_v38 }
 0x1fe   : > { %1665 = vmatmul.mubr.f32.gmra.mxu1 %v1337_v27 }
 0x1ff   : > { %1670 = vmatprep.mubr.f32.mxu1 %v1370_v25  ;;  %v2799_v47 = vpop.eup %2798 }
 0x200   : > { %v1340_v50 = vmul.f32 %v2857_v49, %v2799_v47 }
 0x202   : > { %1671 = vmatmul.mubr.f32.gmra.mxu1 %v1338_v31  ;;  %v2801_v48 = vpop.eup %2800 }
 0x203   : > { %1676 = vmatprep.mubr.f32.mxu1 %v1371_v42  ;;  %v2803_v51 = vpop.eup %2802  ;;  %v1373_v53 = vmul.f32 %v2858_v52, %v2801_v48 }
 0x204   : > { %v1341_v55 = vmul.f32 %v2859_v54, %v2803_v51 }
 0x206   : > { %1677 = vmatmul.mubr.f32.gmra.mxu1 %v1339_v46 }
 0x207   : > { %1682 = vmatprep.mubr.f32.mxu1 %v1372_v44 }
 0x20a   : > { %1683 = vmatmul.mubr.f32.gmra.mxu1 %v1340_v50 }
 0x20b   : > { %1688 = vmatprep.mubr.f32.mxu1 %v1373_v53 }
 0x20e   : > { %1689 = vmatmul.mubr.f32.gmra.mxu1 %v1341_v55 }
 0x252   : > { %v1504_v0 = vpop.f32.mrf.mxu0 }
 0x253   : > { %v1707_v1 = vmul.f32 %v3578_v32, %v1504_v0 }
 0x254   : > { %v1506_v2 = vpop.f32.mrf.mxu0 }
 0x255   : > { %v1783_v3 = vadd.f32 %v3580_v62, %v1707_v1  ;;  %v1708_v4 = vmul.f32 %v3582_v58, %v1506_v2 }
 0x256   : > { %v1510_v5 = vpop.f32.mrf.mxu0 }
 0x257   : > { %v1847_v6 = vmax.f32 %v1783_v3, 0.0  ;;  %v1784_v8 = vadd.f32 %v3586_v63, %v1708_v4  ;;  %v1709_v9 = vmul.f32 %v3578_v32, %v1510_v5 }
 0x258   : > { %v1512_v10 = vpop.f32.mrf.mxu0 }
 0x259   : > { %1911 = vst [vmem:[%s3592_s18] sm:$0xff] %v1847_v6  ;;  %v1848_v12 = vmax.f32 %v1784_v8, 0.0  ;;  %v1785_v34 = vadd.f32 %v3580_v62, %v1709_v9  ;;  %v1710_v14 = vmul.f32 %v3582_v58, %v1512_v10 }
 0x25a   : > { %v1516_v7 = vpop.f32.mrf.mxu0 }
 0x25b   : > { %1912 = vst [vmem:[%s3592_s18 + $0x8] sm:$0xff] %v1848_v12  ;;  %v1849_v37 = vmax.f32 %v1785_v34, 0.0  ;;  %v1786_v15 = vadd.f32 %v3586_v63, %v1710_v14  ;;  %v1711_v16 = vmul.f32 %v3578_v32, %v1516_v7 }
 0x25c   : > { %v1518_v13 = vpop.f32.mrf.mxu0 }
 0x25d   : > { %1913 = vst [vmem:[%s3592_s18 + $0x10] sm:$0xff] %v1849_v37  ;;  %v1850_v17 = vmax.f32 %v1786_v15, 0.0  ;;  %v1787_v35 = vadd.f32 %v3580_v62, %v1711_v16  ;;  %v1712_v18 = vmul.f32 %v3582_v58, %v1518_v13 }
 0x25e   : > { %v1522_v19 = vpop.f32.mrf.mxu0 }
 0x25f   : > { %1914 = vst [vmem:[%s3592_s18 + $0x18] sm:$0xff] %v1850_v17  ;;  %v1851_v11 = vmax.f32 %v1787_v35, 0.0  ;;  %v1788_v20 = vadd.f32 %v3586_v63, %v1712_v18  ;;  %v1713_v36 = vmul.f32 %v3578_v32, %v1522_v19 }
 0x260   : > { %v1524_v21 = vpop.f32.mrf.mxu0 }
 0x261   : > { %1915 = vst [vmem:[%s3592_s18 + $0x20] sm:$0xff] %v1851_v11  ;;  %v1852_v22 = vmax.f32 %v1788_v20, 0.0  ;;  %v1789_v23 = vadd.f32 %v3580_v62, %v1713_v36  ;;  %v1714_v41 = vmul.f32 %v3582_v58, %v1524_v21 }
 0x262   : > { %v1528_v24 = vpop.f32.mrf.mxu0 }
 0x263   : > { %1916 = vst [vmem:[%s3592_s18 + $0x28] sm:$0xff] %v1852_v22  ;;  %v1853_v25 = vmax.f32 %v1789_v23, 0.0  ;;  %v1790_v26 = vadd.f32 %v3586_v63, %v1714_v41  ;;  %v1715_v27 = vmul.f32 %v3578_v32, %v1528_v24 }
 0x264   : > { %v1530_v28 = vpop.f32.mrf.mxu0 }
 0x265   : > { %1917 = vst [vmem:[%s3592_s18 + $0x30] sm:$0xff] %v1853_v25  ;;  %v1854_v40 = vmax.f32 %v1790_v26, 0.0  ;;  %v1791_v29 = vadd.f32 %v3580_v62, %v1715_v27  ;;  %v1716_v30 = vmul.f32 %v3582_v58, %v1530_v28 }
 0x266   : > { %v1534_v31 = vpop.f32.mrf.mxu0 }
 0x267   : > { %1918 = vst [vmem:[%s3592_s18 + $0x38] sm:$0xff] %v1854_v40  ;;  %v1855_v38 = vmax.f32 %v1791_v29, 0.0  ;;  %v1792_v39 = vadd.f32 %v3586_v63, %v1716_v30  ;;  %v1717_v42 = vmul.f32 %v3578_v32, %v1534_v31 }
 0x268   : > { %v1536_v43 = vpop.f32.mrf.mxu0 }
 0x269   : > { %1919 = vst [vmem:[%s3592_s18 + $0x40] sm:$0xff] %v1855_v38  ;;  %v1856_v44 = vmax.f32 %v1792_v39, 0.0  ;;  %v1793_v45 = vadd.f32 %v3580_v62, %v1717_v42  ;;  %v1718_v46 = vmul.f32 %v3582_v58, %v1536_v43 }
 0x26a   : > { %v1540_v47 = vpop.f32.mrf.mxu0 }
 0x26b   : > { %1920 = vst [vmem:[%s3592_s18 + $0x48] sm:$0xff] %v1856_v44  ;;  %v1857_v48 = vmax.f32 %v1793_v45, 0.0  ;;  %v1794_v49 = vadd.f32 %v3586_v63, %v1718_v46  ;;  %v1719_v50 = vmul.f32 %v3578_v32, %v1540_v47 }
 0x26c   : > { %v1542_v51 = vpop.f32.mrf.mxu0 }
 0x26d   : > { %1921 = vst [vmem:[%s3592_s18 + $0x50] sm:$0xff] %v1857_v48  ;;  %v1858_v52 = vmax.f32 %v1794_v49, 0.0  ;;  %v1795_v53 = vadd.f32 %v3580_v62, %v1719_v50  ;;  %v1720_v54 = vmul.f32 %v3582_v58, %v1542_v51 }
 0x26e   : > { %v1546_v55 = vpop.f32.mrf.mxu0 }
 0x26f   : > { %1922 = vst [vmem:[%s3592_s18 + $0x58] sm:$0xff] %v1858_v52  ;;  %v1859_v56 = vmax.f32 %v1795_v53, 0.0  ;;  %v1796_v57 = vadd.f32 %v3586_v63, %v1720_v54  ;;  %v1721_v59 = vmul.f32 %v3578_v32, %v1546_v55 }
 0x270   : > { %v1548_v60 = vpop.f32.mrf.mxu0 }
 0x271   : > { %1923 = vst [vmem:[%s3592_s18 + $0x60] sm:$0xff] %v1859_v56  ;;  %v1860_v61 = vmax.f32 %v1796_v57, 0.0  ;;  %v1797_v33 = vadd.f32 %v3580_v62, %v1721_v59  ;;  %v1722_v0 = vmul.f32 %v3582_v58, %v1548_v60 }
 0x272   : > { %v1552_v1 = vpop.f32.mrf.mxu0 }
 0x273   : > { %1924 = vst [vmem:[%s3592_s18 + $0x68] sm:$0xff] %v1860_v61  ;;  %v1861_v2 = vmax.f32 %v1797_v33, 0.0  ;;  %v1798_v3 = vadd.f32 %v3586_v63, %v1722_v0  ;;  %v1723_v4 = vmul.f32 %v3578_v32, %v1552_v1 }
 0x274   : > { %v1554_v5 = vpop.f32.mrf.mxu0 }
 0x275   : > { %1925 = vst [vmem:[%s3592_s18 + $0x70] sm:$0xff] %v1861_v2  ;;  %v1862_v6 = vmax.f32 %v1798_v3, 0.0  ;;  %v1799_v8 = vadd.f32 %v3580_v62, %v1723_v4  ;;  %v1724_v9 = vmul.f32 %v3582_v58, %v1554_v5 }
 0x276   : > { %v1558_v10 = vpop.f32.mrf.mxu0 }
 0x277   : > { %1926 = vst [vmem:[%s3592_s18 + $0x78] sm:$0xff] %v1862_v6  ;;  %v1863_v12 = vmax.f32 %v1799_v8, 0.0  ;;  %v1800_v34 = vadd.f32 %v3586_v63, %v1724_v9  ;;  %v1725_v14 = vmul.f32 %v3578_v32, %v1558_v10 }
 0x278   : > { %v1560_v7 = vpop.f32.mrf.mxu0 }
 0x279   : > { %1927 = vst [vmem:[%s3592_s18 + $0x80] sm:$0xff] %v1863_v12  ;;  %v1864_v37 = vmax.f32 %v1800_v34, 0.0  ;;  %v1801_v15 = vadd.f32 %v3580_v62, %v1725_v14  ;;  %v1726_v16 = vmul.f32 %v3582_v58, %v1560_v7 }
 0x27a   : > { %v1564_v13 = vpop.f32.mrf.mxu0 }
 0x27b   : > { %1928 = vst [vmem:[%s3592_s18 + $0x88] sm:$0xff] %v1864_v37  ;;  %v1865_v17 = vmax.f32 %v1801_v15, 0.0  ;;  %v1802_v35 = vadd.f32 %v3586_v63, %v1726_v16  ;;  %v1727_v18 = vmul.f32 %v3578_v32, %v1564_v13 }
 0x27c   : > { %v1566_v19 = vpop.f32.mrf.mxu0 }
 0x27d   : > { %1929 = vst [vmem:[%s3592_s18 + $0x90] sm:$0xff] %v1865_v17  ;;  %v1866_v11 = vmax.f32 %v1802_v35, 0.0  ;;  %v1803_v20 = vadd.f32 %v3580_v62, %v1727_v18  ;;  %v1728_v36 = vmul.f32 %v3582_v58, %v1566_v19 }
 0x27e   : > { %v1570_v21 = vpop.f32.mrf.mxu0 }
 0x27f   : > { %1930 = vst [vmem:[%s3592_s18 + $0x98] sm:$0xff] %v1866_v11  ;;  %v1867_v22 = vmax.f32 %v1803_v20, 0.0  ;;  %v1804_v23 = vadd.f32 %v3586_v63, %v1728_v36  ;;  %v1729_v41 = vmul.f32 %v3578_v32, %v1570_v21 }
 0x280   : > { %v1572_v24 = vpop.f32.mrf.mxu0 }
 0x281   : > { %1931 = vst [vmem:[%s3592_s18 + $0xa0] sm:$0xff] %v1867_v22  ;;  %v1868_v25 = vmax.f32 %v1804_v23, 0.0  ;;  %v1805_v26 = vadd.f32 %v3580_v62, %v1729_v41  ;;  %v1730_v27 = vmul.f32 %v3582_v58, %v1572_v24 }
 0x282   : > { %v1576_v28 = vpop.f32.mrf.mxu0 }
 0x283   : > { %1932 = vst [vmem:[%s3592_s18 + $0xa8] sm:$0xff] %v1868_v25  ;;  %v1869_v40 = vmax.f32 %v1805_v26, 0.0  ;;  %v1806_v29 = vadd.f32 %v3586_v63, %v1730_v27  ;;  %v1731_v30 = vmul.f32 %v3578_v32, %v1576_v28 }
 0x284   : > { %v1578_v31 = vpop.f32.mrf.mxu0 }
 0x285   : > { %1933 = vst [vmem:[%s3592_s18 + $0xb0] sm:$0xff] %v1869_v40  ;;  %v1870_v38 = vmax.f32 %v1806_v29, 0.0  ;;  %v1807_v39 = vadd.f32 %v3580_v62, %v1731_v30  ;;  %v1732_v42 = vmul.f32 %v3582_v58, %v1578_v31 }
 0x286   : > { %v1582_v43 = vpop.f32.mrf.mxu0 }
 0x287   : > { %1934 = vst [vmem:[%s3592_s18 + $0xb8] sm:$0xff] %v1870_v38  ;;  %v1871_v44 = vmax.f32 %v1807_v39, 0.0  ;;  %v1808_v45 = vadd.f32 %v3586_v63, %v1732_v42  ;;  %v1733_v46 = vmul.f32 %v3578_v32, %v1582_v43 }
 0x288   : > { %v1584_v47 = vpop.f32.mrf.mxu0 }
 0x289   : > { %1935 = vst [vmem:[%s3592_s18 + $0xc0] sm:$0xff] %v1871_v44  ;;  %v1872_v48 = vmax.f32 %v1808_v45, 0.0  ;;  %v1809_v49 = vadd.f32 %v3580_v62, %v1733_v46  ;;  %v1734_v50 = vmul.f32 %v3582_v58, %v1584_v47 }
 0x28a   : > { %v1588_v51 = vpop.f32.mrf.mxu0 }
 0x28b   : > { %1936 = vst [vmem:[%s3592_s18 + $0xc8] sm:$0xff] %v1872_v48  ;;  %v1873_v52 = vmax.f32 %v1809_v49, 0.0  ;;  %v1810_v53 = vadd.f32 %v3586_v63, %v1734_v50  ;;  %v1735_v54 = vmul.f32 %v3578_v32, %v1588_v51 }
 0x28c   : > { %v1590_v55 = vpop.f32.mrf.mxu0 }
 0x28d   : > { %1937 = vst [vmem:[%s3592_s18 + $0xd0] sm:$0xff] %v1873_v52  ;;  %v1874_v56 = vmax.f32 %v1810_v53, 0.0  ;;  %v1811_v57 = vadd.f32 %v3580_v62, %v1735_v54  ;;  %v1736_v59 = vmul.f32 %v3582_v58, %v1590_v55 }
 0x28e   : > { %v1594_v60 = vpop.f32.mrf.mxu0 }
 0x28f   : > { %1938 = vst [vmem:[%s3592_s18 + $0xd8] sm:$0xff] %v1874_v56  ;;  %v1875_v61 = vmax.f32 %v1811_v57, 0.0  ;;  %v1812_v33 = vadd.f32 %v3586_v63, %v1736_v59  ;;  %v1737_v0 = vmul.f32 %v3578_v32, %v1594_v60 }
 0x290   : > { %v1596_v1 = vpop.f32.mrf.mxu0 }
 0x291   : > { %1939 = vst [vmem:[%s3592_s18 + $0xe0] sm:$0xff] %v1875_v61  ;;  %v1876_v2 = vmax.f32 %v1812_v33, 0.0  ;;  %v1813_v3 = vadd.f32 %v3580_v62, %v1737_v0  ;;  %v1738_v4 = vmul.f32 %v3582_v58, %v1596_v1 }
 0x292   : > { %v1600_v5 = vpop.f32.mrf.mxu1 }
 0x293   : > { %v1739_v6 = vmul.f32 %v3578_v32, %v1600_v5  ;;  %1940 = vst [vmem:[%s3592_s18 + $0xe8] sm:$0xff] %v1876_v2  ;;  %v1877_v8 = vmax.f32 %v1813_v3, 0.0  ;;  %v1814_v9 = vadd.f32 %v3586_v63, %v1738_v4 }
 0x294   : > { %v1602_v10 = vpop.f32.mrf.mxu1 }
 0x295   : > { %v1815_v12 = vadd.f32 %v3580_v62, %v1739_v6  ;;  %v1740_v34 = vmul.f32 %v3582_v58, %v1602_v10  ;;  %1941 = vst [vmem:[%s3592_s18 + $0xf0] sm:$0xff] %v1877_v8  ;;  %v1878_v14 = vmax.f32 %v1814_v9, 0.0 }
 0x296   : > { %v1606_v7 = vpop.f32.mrf.mxu1 }
 0x297   : > { %v1879_v37 = vmax.f32 %v1815_v12, 0.0  ;;  %v1816_v15 = vadd.f32 %v3586_v63, %v1740_v34  ;;  %v1741_v16 = vmul.f32 %v3578_v32, %v1606_v7  ;;  %1942 = vst [vmem:[%s3592_s18 + $0xf8] sm:$0xff] %v1878_v14 }
 0x298   : > { %v1608_v13 = vpop.f32.mrf.mxu1 }
 0x299   : > { %1943 = vst [vmem:[%s3592_s18 + $0x100] sm:$0xff] %v1879_v37  ;;  %v1880_v17 = vmax.f32 %v1816_v15, 0.0  ;;  %v1817_v35 = vadd.f32 %v3580_v62, %v1741_v16  ;;  %v1742_v18 = vmul.f32 %v3582_v58, %v1608_v13 }
 0x29a   : > { %v1612_v19 = vpop.f32.mrf.mxu1 }
 0x29b   : > { %1944 = vst [vmem:[%s3592_s18 + $0x108] sm:$0xff] %v1880_v17  ;;  %v1881_v11 = vmax.f32 %v1817_v35, 0.0  ;;  %v1818_v20 = vadd.f32 %v3586_v63, %v1742_v18  ;;  %v1743_v36 = vmul.f32 %v3578_v32, %v1612_v19 }
 0x29c   : > { %v1614_v21 = vpop.f32.mrf.mxu1 }
 0x29d   : > { %1945 = vst [vmem:[%s3592_s18 + $0x110] sm:$0xff] %v1881_v11  ;;  %v1882_v22 = vmax.f32 %v1818_v20, 0.0  ;;  %v1819_v23 = vadd.f32 %v3580_v62, %v1743_v36  ;;  %v1744_v41 = vmul.f32 %v3582_v58, %v1614_v21 }
 0x29e   : > { %v1618_v24 = vpop.f32.mrf.mxu1 }
 0x29f   : > { %1946 = vst [vmem:[%s3592_s18 + $0x118] sm:$0xff] %v1882_v22  ;;  %v1883_v25 = vmax.f32 %v1819_v23, 0.0  ;;  %v1820_v26 = vadd.f32 %v3586_v63, %v1744_v41  ;;  %v1745_v27 = vmul.f32 %v3578_v32, %v1618_v24 }
 0x2a0   : > { %v1620_v28 = vpop.f32.mrf.mxu1 }
 0x2a1   : > { %1947 = vst [vmem:[%s3592_s18 + $0x120] sm:$0xff] %v1883_v25  ;;  %v1884_v40 = vmax.f32 %v1820_v26, 0.0  ;;  %v1821_v29 = vadd.f32 %v3580_v62, %v1745_v27  ;;  %v1746_v30 = vmul.f32 %v3582_v58, %v1620_v28 }
 0x2a2   : > { %v1624_v31 = vpop.f32.mrf.mxu1 }
 0x2a3   : > { %1948 = vst [vmem:[%s3592_s18 + $0x128] sm:$0xff] %v1884_v40  ;;  %v1885_v38 = vmax.f32 %v1821_v29, 0.0  ;;  %v1822_v39 = vadd.f32 %v3586_v63, %v1746_v30  ;;  %v1747_v42 = vmul.f32 %v3578_v32, %v1624_v31 }
 0x2a4   : > { %v1626_v43 = vpop.f32.mrf.mxu1 }
 0x2a5   : > { %1949 = vst [vmem:[%s3592_s18 + $0x130] sm:$0xff] %v1885_v38  ;;  %v1886_v44 = vmax.f32 %v1822_v39, 0.0  ;;  %v1823_v45 = vadd.f32 %v3580_v62, %v1747_v42  ;;  %v1748_v46 = vmul.f32 %v3582_v58, %v1626_v43 }
 0x2a6   : > { %v1630_v47 = vpop.f32.mrf.mxu1 }
 0x2a7   : > { %1950 = vst [vmem:[%s3592_s18 + $0x138] sm:$0xff] %v1886_v44  ;;  %v1887_v48 = vmax.f32 %v1823_v45, 0.0  ;;  %v1824_v49 = vadd.f32 %v3586_v63, %v1748_v46  ;;  %v1749_v50 = vmul.f32 %v3578_v32, %v1630_v47 }
 0x2a8   : > { %v1632_v51 = vpop.f32.mrf.mxu1 }
 0x2a9   : > { %1951 = vst [vmem:[%s3592_s18 + $0x140] sm:$0xff] %v1887_v48  ;;  %v1888_v52 = vmax.f32 %v1824_v49, 0.0  ;;  %v1825_v53 = vadd.f32 %v3580_v62, %v1749_v50  ;;  %v1750_v54 = vmul.f32 %v3582_v58, %v1632_v51 }
 0x2aa   : > { %v1636_v55 = vpop.f32.mrf.mxu1 }
 0x2ab   : > { %1952 = vst [vmem:[%s3592_s18 + $0x148] sm:$0xff] %v1888_v52  ;;  %v1889_v56 = vmax.f32 %v1825_v53, 0.0  ;;  %v1826_v57 = vadd.f32 %v3586_v63, %v1750_v54  ;;  %v1751_v59 = vmul.f32 %v3578_v32, %v1636_v55 }
 0x2ac   : > { %v1638_v60 = vpop.f32.mrf.mxu1 }
 0x2ad   : > { %1953 = vst [vmem:[%s3592_s18 + $0x150] sm:$0xff] %v1889_v56  ;;  %v1890_v61 = vmax.f32 %v1826_v57, 0.0  ;;  %v1827_v33 = vadd.f32 %v3580_v62, %v1751_v59  ;;  %v1752_v0 = vmul.f32 %v3582_v58, %v1638_v60 }
 0x2ae   : > { %v1642_v1 = vpop.f32.mrf.mxu1 }
 0x2af   : > { %1954 = vst [vmem:[%s3592_s18 + $0x158] sm:$0xff] %v1890_v61  ;;  %v1891_v2 = vmax.f32 %v1827_v33, 0.0  ;;  %v1828_v3 = vadd.f32 %v3586_v63, %v1752_v0  ;;  %v1753_v4 = vmul.f32 %v3578_v32, %v1642_v1 }
 0x2b0   : > { %v1644_v5 = vpop.f32.mrf.mxu1 }
 0x2b1   : > { %1955 = vst [vmem:[%s3592_s18 + $0x160] sm:$0xff] %v1891_v2  ;;  %v1892_v6 = vmax.f32 %v1828_v3, 0.0  ;;  %v1829_v8 = vadd.f32 %v3580_v62, %v1753_v4  ;;  %v1754_v9 = vmul.f32 %v3582_v58, %v1644_v5 }
 0x2b2   : > { %v1648_v10 = vpop.f32.mrf.mxu1 }
 0x2b3   : > { %1956 = vst [vmem:[%s3592_s18 + $0x168] sm:$0xff] %v1892_v6  ;;  %v1893_v12 = vmax.f32 %v1829_v8, 0.0  ;;  %v1830_v34 = vadd.f32 %v3586_v63, %v1754_v9  ;;  %v1755_v14 = vmul.f32 %v3578_v32, %v1648_v10 }
 0x2b4   : > { %v1650_v7 = vpop.f32.mrf.mxu1 }
 0x2b5   : > { %1957 = vst [vmem:[%s3592_s18 + $0x170] sm:$0xff] %v1893_v12  ;;  %v1894_v37 = vmax.f32 %v1830_v34, 0.0  ;;  %v1831_v15 = vadd.f32 %v3580_v62, %v1755_v14  ;;  %v1756_v16 = vmul.f32 %v3582_v58, %v1650_v7 }
 0x2b6   : > { %v1654_v13 = vpop.f32.mrf.mxu1 }
 0x2b7   : > { %1958 = vst [vmem:[%s3592_s18 + $0x178] sm:$0xff] %v1894_v37  ;;  %v1895_v17 = vmax.f32 %v1831_v15, 0.0  ;;  %v1832_v35 = vadd.f32 %v3586_v63, %v1756_v16  ;;  %v1757_v18 = vmul.f32 %v3578_v32, %v1654_v13 }
 0x2b8   : > { %v1656_v19 = vpop.f32.mrf.mxu1 }
 0x2b9   : > { %1959 = vst [vmem:[%s3592_s18 + $0x180] sm:$0xff] %v1895_v17  ;;  %v1896_v11 = vmax.f32 %v1832_v35, 0.0  ;;  %v1833_v20 = vadd.f32 %v3580_v62, %v1757_v18  ;;  %v1758_v36 = vmul.f32 %v3582_v58, %v1656_v19 }
 0x2ba   : > { %v1660_v21 = vpop.f32.mrf.mxu1 }
 0x2bb   : > { %1960 = vst [vmem:[%s3592_s18 + $0x188] sm:$0xff] %v1896_v11  ;;  %v1897_v22 = vmax.f32 %v1833_v20, 0.0  ;;  %v1834_v23 = vadd.f32 %v3586_v63, %v1758_v36  ;;  %v1759_v41 = vmul.f32 %v3578_v32, %v1660_v21 }
 0x2bc   : > { %v1662_v24 = vpop.f32.mrf.mxu1 }
 0x2bd   : > { %1961 = vst [vmem:[%s3592_s18 + $0x190] sm:$0xff] %v1897_v22  ;;  %v1898_v25 = vmax.f32 %v1834_v23, 0.0  ;;  %v1835_v26 = vadd.f32 %v3580_v62, %v1759_v41  ;;  %v1760_v27 = vmul.f32 %v3582_v58, %v1662_v24 }
 0x2be   : > { %v1666_v28 = vpop.f32.mrf.mxu1 }
 0x2bf   : > { %1962 = vst [vmem:[%s3592_s18 + $0x198] sm:$0xff] %v1898_v25  ;;  %v1899_v40 = vmax.f32 %v1835_v26, 0.0  ;;  %v1836_v29 = vadd.f32 %v3586_v63, %v1760_v27  ;;  %v1761_v30 = vmul.f32 %v3578_v32, %v1666_v28 }
 0x2c0   : > { %v1668_v31 = vpop.f32.mrf.mxu1 }
 0x2c1   : > { %1963 = vst [vmem:[%s3592_s18 + $0x1a0] sm:$0xff] %v1899_v40  ;;  %v1900_v38 = vmax.f32 %v1836_v29, 0.0  ;;  %v1837_v39 = vadd.f32 %v3580_v62, %v1761_v30  ;;  %v1762_v42 = vmul.f32 %v3582_v58, %v1668_v31 }
 0x2c2   : > { %v1672_v43 = vpop.f32.mrf.mxu1 }
 0x2c3   : > { %1964 = vst [vmem:[%s3592_s18 + $0x1a8] sm:$0xff] %v1900_v38  ;;  %v1901_v44 = vmax.f32 %v1837_v39, 0.0  ;;  %v1838_v45 = vadd.f32 %v3586_v63, %v1762_v42  ;;  %v1763_v46 = vmul.f32 %v3578_v32, %v1672_v43 }
 0x2c4   : > { %v1674_v47 = vpop.f32.mrf.mxu1 }
 0x2c5   : > { %1965 = vst [vmem:[%s3592_s18 + $0x1b0] sm:$0xff] %v1901_v44  ;;  %v1902_v48 = vmax.f32 %v1838_v45, 0.0  ;;  %v1839_v49 = vadd.f32 %v3580_v62, %v1763_v46  ;;  %v1764_v50 = vmul.f32 %v3582_v58, %v1674_v47 }
 0x2c6   : > { %v1678_v51 = vpop.f32.mrf.mxu1 }
 0x2c7   : > { %1966 = vst [vmem:[%s3592_s18 + $0x1b8] sm:$0xff] %v1902_v48  ;;  %v1903_v52 = vmax.f32 %v1839_v49, 0.0  ;;  %v1840_v53 = vadd.f32 %v3586_v63, %v1764_v50  ;;  %v1765_v54 = vmul.f32 %v3578_v32, %v1678_v51 }
 0x2c8   : > { %v1680_v55 = vpop.f32.mrf.mxu1 }
 0x2c9   : > { %1967 = vst [vmem:[%s3592_s18 + $0x1c0] sm:$0xff] %v1903_v52  ;;  %v1904_v56 = vmax.f32 %v1840_v53, 0.0  ;;  %v1841_v57 = vadd.f32 %v3580_v62, %v1765_v54  ;;  %v1766_v59 = vmul.f32 %v3582_v58, %v1680_v55 }
 0x2ca   : > { %v1684_v60 = vpop.f32.mrf.mxu1 }
 0x2cb   : > { %1968 = vst [vmem:[%s3592_s18 + $0x1c8] sm:$0xff] %v1904_v56  ;;  %v1905_v61 = vmax.f32 %v1841_v57, 0.0  ;;  %v1842_v33 = vadd.f32 %v3586_v63, %v1766_v59  ;;  %v1767_v0 = vmul.f32 %v3578_v32, %v1684_v60 }
 0x2cc   : > { %v1686_v1 = vpop.f32.mrf.mxu1 }
 0x2cd   : > { %1969 = vst [vmem:[%s3592_s18 + $0x1d0] sm:$0xff] %v1905_v61  ;;  %v1906_v2 = vmax.f32 %v1842_v33, 0.0  ;;  %v1843_v3 = vadd.f32 %v3580_v62, %v1767_v0  ;;  %v1768_v4 = vmul.f32 %v3582_v58, %v1686_v1 }
 0x2ce   : > { %v1690_v5 = vpop.f32.mrf.mxu1 }
 0x2cf   : > { %1970 = vst [vmem:[%s3592_s18 + $0x1d8] sm:$0xff] %v1906_v2  ;;  %v1907_v6 = vmax.f32 %v1843_v3, 0.0  ;;  %v1844_v8 = vadd.f32 %v3586_v63, %v1768_v4  ;;  %v1769_v9 = vmul.f32 %v3578_v32, %v1690_v5 }
 0x2d0   : > { %v1692_v10 = vpop.f32.mrf.mxu1 }
 0x2d1   : > { %1971 = vst [vmem:[%s3592_s18 + $0x1e0] sm:$0xff] %v1907_v6  ;;  %v1908_v12 = vmax.f32 %v1844_v8, 0.0  ;;  %v1845_v34 = vadd.f32 %v3580_v62, %v1769_v9  ;;  %v1770_v14 = vmul.f32 %v3582_v58, %v1692_v10 }
 0x2d3   : > { %1972 = vst [vmem:[%s3592_s18 + $0x1e8] sm:$0xff] %v1908_v12  ;;  %v1909_v7 = vmax.f32 %v1845_v34, 0.0  ;;  %v1846_v37 = vadd.f32 %v3586_v63, %v1770_v14 }
 0x2d5   : > { %1973 = vst [vmem:[%s3592_s18 + $0x1f0] sm:$0xff] %v1909_v7  ;;  %v1910_v32 = vmax.f32 %v1846_v37, 0.0 }
 0x2d7   : > { %1974 = vst [vmem:[%s3592_s18 + $0x1f8] sm:$0xff] %v1910_v32 }
 0x2d8   : > { %3007 = shalt.err (!%p3004_p6)
}
 0x2d9   : > { %s3008_s21 = scalar_lea.hbm %s3784_s13, 8192  ;;  %s3012_s10 = scalar_lea.hbm %s3838_s7, 16384 }
 0x2da   : > { %p3009_p7 = scmp.ne.s32.totalorder %s3784_s13, %s3008_s21  ;;  %p3013_p11 = scmp.lt.s32.totalorder %s3784_s13, %s3838_s7 }
 0x2db   : > { %p3014_p3 = scmp.lt.s32.totalorder %s3012_s10, %s3008_s21 }
 0x2dc   : > { %p3010_p5 = pnand %p3009_p7, %p3870_p13 }
 0x2dd   : > { %p3015_p12 = por %p3014_p3, %p3013_p11 }
 0x2de   : > { %p3011_p8 = pneg %p3010_p5 }
 0x2e0   : > { %p3016_p9 = pnand %p3015_p12, %p3011_p8 }
 0x2e2   : > { %3019 = shalt.err (!%p3016_p9)
}
 0x2e3   : > { %s3082_s4 = smov 256   ;;  %s3083_s22 = smov 16  }
 0x2e4   : > { %2476 = dma.vmem_to_hbm [thread:$0]  (%p3870_p13), %s3786_s12, 8192, %s3784_s13, %s1976_s15, %s3082_s4, %s3082_s4, %s3083_s22  }
 0x2e5 PF: > { %s2004_s14 = sand.u32 1, %s3058_s24   ;;  %p3871_p0 = scmp.ne.s32.totalorder %s3853_s8, 0 }
 0x2e6   : > { %p3872_p2 = scmp.ge.s32.totalorder %s3070_s27, 2  ;;  %s2005_s18 = scalar_lea.sflag [#allocation4], %s2004_s14 }
 0x2e8   : > { %p2496_p10 = pnand %p3872_p2, %p3871_p0 }
 0x2ea   : > { %p2497_p1 = pneg %p2496_p10 }
 0x2ec   : > { %3053 = dma.done.wait (%p2497_p1), %s2005_s18, 8192  }
 0x2ed   : > { %3055 = vsyncadd (%p2497_p1), %s2005_s18, 4294959104  ;;  %s3873_s2 = sld [smem:[#allocation17_spill]]  ;;  %p24_p4 = scmp.ge.s32.totalorder %s3210_s17, 4  }
 0x2ee   : > { %s3874_s26 = sld [smem:[#allocation18_spill]]  ;;  %s3875_s24 = smov %s3062_s25 }
 0x2ef   : > { %s3877_s27 = smov %s3210_s17  ;;  %26 = sbr.rel (!%p24_p4) target bundleno = 13 (0xd), region = 118 }
 0x2f3   : > { %s3876_s25 = smov %s3873_s2 }
 0x2f4   :  { %2010 = vsyncpa [#allocation3], 1 }
 0x2f5   :  { %2012 = vsyncpa [#allocation3 + $0x1], 1 }
 0x2f6   :  { %2013 = vsyncpa [#allocation6], 1 }
 0x2f7   :  { %2015 = vsyncpa [#allocation6 + $0x1], 1 }
 0x2f8   :  { %2016 = vsyncpa [#allocation9], 1 }
 0x2f9   :  { %2017 = vsyncpa [#allocation4], 1 }
 0x2fa   :  { %2019 = vsyncpa [#allocation4 + $0x1], 1 }

</bundles_post_ra>
